<compile_context>
chip_gen: v6e
topology: v6e:2x2x1
jax: 0.10.0
libtpu: 0.0.40
codegen_flags: <defaults>
</compile_context>

<pallas_src>
import functools
import math

import jax
import jax.numpy as jnp
from jax.experimental import pallas as pl
from jax.experimental.pallas import tpu as pltpu


def _default_vmem_limit():
    """Per-generation VMEM budget: ~3/4 of physical, capped at 100 MiB.
    v7x (64 MiB/TC) -> 48 MiB; v5e/v6e (128 MiB) -> 96 MiB.  Falls back to the
    v7x-safe 48 MiB if the query is unavailable."""
    cap = 64 * 1024 * 1024
    try:
        info = pltpu.get_tpu_info()
        cap = getattr(info, "vmem_capacity_bytes", cap) or cap
    except Exception:
        pass
    return min((cap * 3) // 4, 100 * 1024 * 1024)


VMEM_LIMIT = _default_vmem_limit()

# GEMM tile targets (bf16 tiles, f32 accumulator).  At tm=1024/tn=1024/tk=768 a GEMM step uses
# ~14 MiB (x 2-buf + w 2-buf + f32 acc + out 2-buf); the full-3H QKV GEMM peaks at ~28 MiB --
# both fit the 48 MiB v7x budget with headroom.
TM_DEFAULT = 1024
TN_DEFAULT = 1024
TK_DEFAULT = 768

# Attention tile targets.  512 keeps the 2x256^2 MXU fed on v6e/v7x; use 256 on v5e.
TQ_DEFAULT = 512
TKV_DEFAULT = 512


def _tile(dim, target, base):
    """Largest tile <= target that divides `dim` and is a multiple of `base`
    (8 for sublane dims, 128 for lane dims).  Falls back to the full dim, which
    is always a legal block size."""
    if dim <= target:
        return dim
    t = (target // base) * base
    while t >= base:
        if dim % t == 0:
            return t
        t -= base
    return dim


# ----------------------------- tiled GEMM + bias (+activation) -----------------------------

def _matmul_bias_act_kernel(x_ref, w_ref, b_ref, o_ref, acc_ref, *, activation):
    k = pl.program_id(2)

    @pl.when(k == 0)
    def _():
        acc_ref[...] = jnp.zeros_like(acc_ref)

    acc_ref[...] += jnp.dot(x_ref[...], w_ref[...], preferred_element_type=jnp.float32)

    @pl.when(k == pl.num_programs(2) - 1)
    def _():
        y = acc_ref[...] + b_ref[...].astype(jnp.float32)
        if activation == "gelu":
            # TODO(synk): HF BERT default is exact (erf) GELU; tanh approximation used here.
            y = jax.nn.gelu(y, approximate=True)
        elif activation == "tanh":
            y = jnp.tanh(y)
        o_ref[...] = y.astype(o_ref.dtype)


def linear_act(x, w, b, *, activation="none", out_dtype=jnp.bfloat16,
               tm=TM_DEFAULT, tn=TN_DEFAULT, tk=TK_DEFAULT):
    M, K = x.shape
    N = w.shape[1]
    tm = _tile(M, tm, 8)
    tn = _tile(N, tn, 128)
    tk = _tile(K, tk, 128)
    return pl.pallas_call(
        functools.partial(_matmul_bias_act_kernel, activation=activation),
        out_shape=jax.ShapeDtypeStruct((M, N), out_dtype),
        grid=(M // tm, N // tn, K // tk),
        in_specs=[
            pl.BlockSpec((tm, tk), lambda i, j, k: (i, k)),
            pl.BlockSpec((tk, tn), lambda i, j, k: (k, j)),
            pl.BlockSpec((1, tn), lambda i, j, k: (0, j)),
        ],
        out_specs=pl.BlockSpec((tm, tn), lambda i, j, k: (i, j)),
        scratch_shapes=[pltpu.VMEM((tm, tn), jnp.float32)],
        compiler_params=pltpu.CompilerParams(
            dimension_semantics=("parallel", "parallel", "arbitrary"),
            vmem_limit_bytes=VMEM_LIMIT),
    )(x, w, b.reshape(1, N))


# ----------------------------- tiled GEMM + residual + LayerNorm -----------------------------

def _matmul_res_ln_kernel(x_ref, w_ref, b_ref, res_ref, g_ref, beta_ref, o_ref, acc_ref, *, eps):
    k = pl.program_id(1)

    @pl.when(k == 0)
    def _():
        acc_ref[...] = jnp.zeros_like(acc_ref)

    acc_ref[...] += jnp.dot(x_ref[...], w_ref[...], preferred_element_type=jnp.float32)

    @pl.when(k == pl.num_programs(1) - 1)
    def _():
        y = acc_ref[...] + b_ref[...].astype(jnp.float32) + res_ref[...].astype(jnp.float32)
        mu = jnp.mean(y, axis=-1, keepdims=True)
        var = jnp.mean(jnp.square(y - mu), axis=-1, keepdims=True)
        yn = (y - mu) * jax.lax.rsqrt(var + eps)
        o_ref[...] = (yn * g_ref[...].astype(jnp.float32)
                      + beta_ref[...].astype(jnp.float32)).astype(o_ref.dtype)


def linear_residual_layernorm(x, w, b, residual, gamma, beta, *, eps=1e-12,
                              out_dtype=jnp.bfloat16, tm=TM_DEFAULT, tk=TK_DEFAULT):
    """LayerNorm((x @ w + b) + residual) * gamma + beta, with the LN fused into the GEMM
    epilogue.  The full hidden dim H is kept as a single N tile so the row statistics are
    computable in the finalize step (lane-dense output store)."""
    M, K = x.shape
    N = w.shape[1]
    tm = _tile(M, tm, 8)
    tk = _tile(K, tk, 128)
    return pl.pallas_call(
        functools.partial(_matmul_res_ln_kernel, eps=eps),
        out_shape=jax.ShapeDtypeStruct((M, N), out_dtype),
        grid=(M // tm, K // tk),
        in_specs=[
            pl.BlockSpec((tm, tk), lambda i, k: (i, k)),
            pl.BlockSpec((tk, N), lambda i, k: (k, 0)),
            pl.BlockSpec((1, N), lambda i, k: (0, 0)),
            pl.BlockSpec((tm, N), lambda i, k: (i, 0)),
            pl.BlockSpec((1, N), lambda i, k: (0, 0)),
            pl.BlockSpec((1, N), lambda i, k: (0, 0)),
        ],
        out_specs=pl.BlockSpec((tm, N), lambda i, k: (i, 0)),
        scratch_shapes=[pltpu.VMEM((tm, N), jnp.float32)],
        compiler_params=pltpu.CompilerParams(
            dimension_semantics=("parallel", "arbitrary"),
            vmem_limit_bytes=VMEM_LIMIT),
    )(x, w, b.reshape(1, N), residual, gamma.reshape(1, N), beta.reshape(1, N))


# ----------------------------- standalone LayerNorm (embeddings) -----------------------------

def _layernorm_kernel(x_ref, g_ref, b_ref, o_ref, *, eps):
    x = x_ref[...].astype(jnp.float32)
    mu = jnp.mean(x, axis=-1, keepdims=True)
    var = jnp.mean(jnp.square(x - mu), axis=-1, keepdims=True)
    y = (x - mu) * jax.lax.rsqrt(var + eps)
    o_ref[...] = (y * g_ref[...].astype(jnp.float32)
                  + b_ref[...].astype(jnp.float32)).astype(o_ref.dtype)


def layernorm(x, g, b, *, eps=1e-12, out_dtype=jnp.bfloat16, tm=TM_DEFAULT):
    M, H = x.shape
    tm = _tile(M, tm, 8)
    return pl.pallas_call(
        functools.partial(_layernorm_kernel, eps=eps),
        out_shape=jax.ShapeDtypeStruct((M, H), out_dtype),
        grid=(M // tm,),
        in_specs=[
            pl.BlockSpec((tm, H), lambda i: (i, 0)),
            pl.BlockSpec((1, H), lambda i: (0, 0)),
            pl.BlockSpec((1, H), lambda i: (0, 0)),
        ],
        out_specs=pl.BlockSpec((tm, H), lambda i: (i, 0)),
        compiler_params=pltpu.CompilerParams(
            dimension_semantics=("parallel",),
            vmem_limit_bytes=VMEM_LIMIT),
    )(x, g.reshape(1, H), b.reshape(1, H))


# ----------------------------- flash-style multi-head attention -----------------------------

def _flash_attn_kernel(q_ref, k_ref, v_ref, mask_ref, o_ref,
                       m_sc, l_sc, acc_sc, *, n_heads, dh, scale, q_off, k_off, v_off):
    # grid: (batch, q-tile, kv-tile); kv is the innermost "arbitrary" axis.
    kvi = pl.program_id(2)

    @pl.when(kvi == 0)
    def _():
        m_sc[...] = jnp.full_like(m_sc, -jnp.inf)
        l_sc[...] = jnp.zeros_like(l_sc)
        acc_sc[...] = jnp.zeros_like(acc_sc)

    mask = mask_ref[0].astype(jnp.float32)                      # (1, tkv), additive

    # Heads live contiguously in the lane axis of the packed QKV blocks; slice with pl.ds
    # (static offsets) instead of split_heads transposes.
    for h in range(n_heads):
        q = q_ref[0, :, pl.ds(q_off + h * dh, dh)] * scale     # (tq,  dh) bf16, scale folded in
        k = k_ref[0, :, pl.ds(k_off + h * dh, dh)]             # (tkv, dh) bf16
        v = v_ref[0, :, pl.ds(v_off + h * dh, dh)]             # (tkv, dh) bf16
        # Contract head dims directly (no explicit k.T -> no XLU transpose per head/kv step).
        s = jax.lax.dot_general(q, k, (((1,), (1,)), ((), ())),
                                preferred_element_type=jnp.float32) + mask      # (tq, tkv)

        m_prev = m_sc[h]                                        # (tq, 1)
        m_new = jnp.maximum(m_prev, jnp.max(s, axis=-1, keepdims=True))
        alpha = jnp.exp(m_prev - m_new)
        # TODO(synk): on v6e/v7x the exp could be done in bf16 (native bf16 EUP); kept f32 here.
        p = jnp.exp(s - m_new)
        l_sc[h] = alpha * l_sc[h] + jnp.sum(p, axis=-1, keepdims=True)
        acc_sc[h] = alpha * acc_sc[h] + jnp.dot(p.astype(v.dtype), v,
                                                preferred_element_type=jnp.float32)
        m_sc[h] = m_new

    @pl.when(kvi == pl.num_programs(2) - 1)
    def _():
        # Assemble the full (tq, H) context and issue ONE lane-dense store instead of
        # n_heads masked dh-wide partial stores.
        slabs = []
        for h in range(n_heads):
            inv_l = pl.reciprocal(l_sc[h], approx=True)         # EUP, off the VALU path
            slabs.append(acc_sc[h] * inv_l)
        o_ref[0] = jnp.concatenate(slabs, axis=-1).astype(o_ref.dtype)


def flash_attention(qkv, mask, *, n_heads, out_dtype=jnp.bfloat16,
                    tq=TQ_DEFAULT, tkv=TKV_DEFAULT):
    """qkv: [B, S, 3H] (q|k|v packed along lanes straight from the fused QKV GEMM),
    mask: [B, 1, S] additive.  Returns context [B, S, H] (lane-dense, ready for the
    output projection)."""
    B, S, H3 = qkv.shape
    H = H3 // 3
    dh = H // n_heads
    tq = _tile(S, tq, 8)
    tkv = _tile(S, tkv, 128)   # tkv is the lane dim of the mask block
    scale = 1.0 / math.sqrt(dh)

    if H % 128 == 0:
        # Efficient path: lane block of width H selects exactly the q / k / v slab -> no
        # over-fetch.  Legal because H is lane-aligned.
        lane_block, q_blk, k_blk, v_blk = H, 0, 1, 2
        q_off = k_off = v_off = 0
    else:
        # Small-H fallback (toy configs): full 3H lane blocks (always a legal block shape);
        # q/k/v picked out inside the kernel by static lane offsets.
        lane_block, q_blk, k_blk, v_blk = H3, 0, 0, 0
        q_off, k_off, v_off = 0, H, 2 * H

    return pl.pallas_call(
        functools.partial(_flash_attn_kernel, n_heads=n_heads, dh=dh, scale=scale,
                          q_off=q_off, k_off=k_off, v_off=v_off),
        out_shape=jax.ShapeDtypeStruct((B, S, H), out_dtype),
        grid=(B, S // tq, S // tkv),
        in_specs=[
            pl.BlockSpec((1, tq, lane_block), lambda b, qi, ki: (b, qi, q_blk)),   # q slab
            pl.BlockSpec((1, tkv, lane_block), lambda b, qi, ki: (b, ki, k_blk)),  # k slab
            pl.BlockSpec((1, tkv, lane_block), lambda b, qi, ki: (b, ki, v_blk)),  # v slab
            pl.BlockSpec((1, 1, tkv), lambda b, qi, ki: (b, 0, ki)),
        ],
        out_specs=pl.BlockSpec((1, tq, H), lambda b, qi, ki: (b, qi, 0)),
        scratch_shapes=[
            pltpu.VMEM((n_heads, tq, 1), jnp.float32),    # running max
            pltpu.VMEM((n_heads, tq, 1), jnp.float32),    # running sum
            pltpu.VMEM((n_heads, tq, dh), jnp.float32),   # running output
        ],
        compiler_params=pltpu.CompilerParams(
            dimension_semantics=("parallel", "parallel", "arbitrary"),
            vmem_limit_bytes=VMEM_LIMIT),
    )(qkv, qkv, qkv, mask)


# ----------------------------- model glue -----------------------------

def init_params(key, *, vocab, max_pos, type_vocab, H, I, L, num_labels):
    keys = iter(jax.random.split(key, 8 + L * 8))

    def nrm(shape, dtype=jnp.float32):
        return (0.02 * jax.random.normal(next(keys), shape, jnp.float32)).astype(dtype)

    params = {
        "word_emb": nrm((vocab, H)),
        "pos_emb": nrm((max_pos, H)),
        "type_emb": nrm((type_vocab, H)),
        "emb_ln_g": jnp.ones((H,), jnp.float32),
        "emb_ln_b": jnp.zeros((H,), jnp.float32),
        "pool_w": nrm((H, H)),
        "pool_b": jnp.zeros((H,), jnp.float32),
        "cls_w": nrm((H, num_labels)),
        "cls_b": jnp.zeros((num_labels,), jnp.float32),
        "layers": [],
    }
    for _ in range(L):
        params["layers"].append({
            # fused QKV: flat weights [H, 3H] / bias [3H]; GEMM weights kept bf16
            "w_qkv": nrm((H, 3 * H), jnp.bfloat16),
            "b_qkv": jnp.zeros((3 * H,), jnp.float32),
            "wo": nrm((H, H), jnp.bfloat16), "bo": jnp.zeros((H,), jnp.float32),
            "ln1_g": jnp.ones((H,), jnp.float32), "ln1_b": jnp.zeros((H,), jnp.float32),
            "wi": nrm((H, I), jnp.bfloat16), "bi": jnp.zeros((I,), jnp.float32),
            "wo2": nrm((I, H), jnp.bfloat16), "bo2": jnp.zeros((H,), jnp.float32),
            "ln2_g": jnp.ones((H,), jnp.float32), "ln2_b": jnp.zeros((H,), jnp.float32),
        })
    return params


def forward(params, input_ids, token_type_ids, attention_mask, labels, *, n_heads, num_labels):
    del num_labels  # label gather is used for the loss; kept for API parity
    B, S = input_ids.shape
    H = params["word_emb"].shape[1]

    # --- embeddings (table gathers stay in glue / XLA); bf16 before the LN kernel halves HBM read
    x = (params["word_emb"][input_ids]
         + params["pos_emb"][jnp.arange(S)][None, :, :]
         + params["type_emb"][token_type_ids]).astype(jnp.bfloat16)             # bf16 [B, S, H]
    x = layernorm(x.reshape(B * S, H), params["emb_ln_g"], params["emb_ln_b"])  # bf16 [B*S, H]

    # additive attention mask; -1e9 (not finfo.min) is robust with online softmax rescaling
    mask = ((1.0 - attention_mask.astype(jnp.float32)) * (-1e9))[:, None, :]    # [B, 1, S]

    for layer in params["layers"]:
        # fused QKV projection: ONE [M, 3H] GEMM, full-3H lane-dense output tile
        qkv = linear_act(x, layer["w_qkv"], layer["b_qkv"],
                         tn=3 * H).reshape(B, S, 3 * H)

        # flash attention; context comes back directly as [B, S, H] (no transposes)
        ctx = flash_attention(qkv, mask, n_heads=n_heads).reshape(B * S, H)

        # attention output projection with fused residual-add + LayerNorm epilogue
        x1 = linear_residual_layernorm(ctx, layer["wo"], layer["bo"], x,
                                       layer["ln1_g"], layer["ln1_b"])

        # FFN intermediate GEMM with fused bias + GELU
        inter = linear_act(x1, layer["wi"], layer["bi"], activation="gelu")

        # FFN output projection with fused residual-add + LayerNorm epilogue
        x = linear_residual_layernorm(inter, layer["wo2"], layer["bo2"], x1,
                                      layer["ln2_g"], layer["ln2_b"])

    x = x.reshape(B, S, H)

    # pooler + classifier + cross-entropy: tiny shapes (lane dims 3 / 1) -> plain jnp per review
    cls = x[:, 0, :].astype(jnp.float32)
    pooled = jnp.tanh(cls @ params["pool_w"] + params["pool_b"])
    logits = pooled @ params["cls_w"] + params["cls_b"]
    logp = jax.nn.log_softmax(logits, axis=-1)
    nll = -jnp.take_along_axis(logp, labels[:, None], axis=-1)[:, 0]
    # TODO(synk): no ignore_index (-100) handling; assumes all labels are valid, like the toy input.
    loss = jnp.mean(nll)
    return {"loss": loss, "logits": logits}


if __name__ == "__main__":
    # Small but lane-aligned hidden size so the efficient (H-wide) attention block path runs.
    B, S, H, N_HEADS, INTER, LAYERS = 2, 8, 128, 2, 256, 2
    VOCAB, MAX_POS, TYPE_VOCAB, NUM_LABELS = 50, 16, 2, 3

    key = jax.random.PRNGKey(0)
    kp, ki, kl = jax.random.split(key, 3)

    params = init_params(kp, vocab=VOCAB, max_pos=MAX_POS, type_vocab=TYPE_VOCAB,
                         H=H, I=INTER, L=LAYERS, num_labels=NUM_LABELS)

    input_ids = jax.random.randint(ki, (B, S), 0, VOCAB, dtype=jnp.int32)
    token_type_ids = jnp.zeros((B, S), jnp.int32)
    attention_mask = jnp.ones((B, S), jnp.int32).at[1, 6:].set(0)
    labels = jax.random.randint(kl, (B,), 0, NUM_LABELS, dtype=jnp.int32)

    fwd = jax.jit(functools.partial(forward, n_heads=N_HEADS, num_labels=NUM_LABELS))
    out = fwd(params, input_ids, token_type_ids, attention_mask, labels)
    jax.block_until_ready(out)

    assert out["logits"].shape == (B, NUM_LABELS)
    assert out["loss"].shape == ()
    assert bool(jnp.isfinite(out["loss"]))
    print("KERNEL_OK")
</pallas_src>

<mosaic_0001>
module attributes {stable_mosaic.version = 11 : i64} {
  func.func @_layernorm_kernel(%arg0: i32, %arg1: memref<16x128xbf16, #tpu.memory_space<vmem>>, %arg2: memref<1x128xf32, #tpu.memory_space<vmem>>, %arg3: memref<1x128xf32, #tpu.memory_space<vmem>>, %arg4: memref<16x128xbf16, #tpu.memory_space<vmem>>) attributes {dimension_semantics = [#tpu.dimension_semantics<parallel>], iteration_bounds = array<i64: 1>, scalar_prefetch = 0 : i64, scratch_operands = 0 : i64, tpu.core_type = #tpu.core_type<tc>, window_params = [{transform_indices = @transform_0, window_bounds = array<i64: 16, 128>}, {pipeline_mode = #tpu.pipeline_mode<synchronous>, transform_indices = @transform_1, window_bounds = array<i64: 1, 128>}, {pipeline_mode = #tpu.pipeline_mode<synchronous>, transform_indices = @transform_2, window_bounds = array<i64: 1, 128>}, {transform_indices = @transform_3, window_bounds = array<i64: 16, 128>}]} {
    %c0 = arith.constant 0 : index
    %c0_0 = arith.constant 0 : index
    %0 = vector.load %arg1[%c0, %c0_0] : memref<16x128xbf16, #tpu.memory_space<vmem>>, vector<16x128xbf16>
    %1 = arith.extf %0 : vector<16x128xbf16> to vector<16x128xf32>
    %cst = arith.constant dense<0.000000e+00> : vector<16xf32>
    %2 = vector.multi_reduction <add>, %1, %cst [1] : vector<16x128xf32> to vector<16xf32>
    %3 = vector.shape_cast %2 : vector<16xf32> to vector<16x1xf32>
    %cst_1 = arith.constant 1.280000e+02 : f32
    %4 = vector.broadcast %cst_1 : f32 to vector<16x1xf32>
    %5 = arith.divf %3, %4 : vector<16x1xf32>
    %6 = vector.broadcast %5 : vector<16x1xf32> to vector<16x128xf32>
    %7 = arith.subf %1, %6 : vector<16x128xf32>
    %8 = arith.mulf %7, %7 : vector<16x128xf32>
    %cst_2 = arith.constant dense<0.000000e+00> : vector<16xf32>
    %9 = vector.multi_reduction <add>, %8, %cst_2 [1] : vector<16x128xf32> to vector<16xf32>
    %10 = vector.shape_cast %9 : vector<16xf32> to vector<16x1xf32>
    %cst_3 = arith.constant 1.280000e+02 : f32
    %11 = vector.broadcast %cst_3 : f32 to vector<16x1xf32>
    %12 = arith.divf %10, %11 : vector<16x1xf32>
    %13 = vector.broadcast %5 : vector<16x1xf32> to vector<16x128xf32>
    %14 = arith.subf %1, %13 : vector<16x128xf32>
    %cst_4 = arith.constant 9.99999996E-13 : f32
    %15 = vector.broadcast %cst_4 : f32 to vector<16x1xf32>
    %16 = arith.addf %12, %15 : vector<16x1xf32>
    %17 = math.rsqrt %16 : vector<16x1xf32>
    %18 = vector.broadcast %17 : vector<16x1xf32> to vector<16x128xf32>
    %19 = arith.mulf %14, %18 : vector<16x128xf32>
    %c0_5 = arith.constant 0 : index
    %c0_6 = arith.constant 0 : index
    %20 = vector.load %arg2[%c0_5, %c0_6] : memref<1x128xf32, #tpu.memory_space<vmem>>, vector<1x128xf32>
    %21 = vector.broadcast %20 : vector<1x128xf32> to vector<16x128xf32>
    %22 = arith.mulf %19, %21 : vector<16x128xf32>
    %c0_7 = arith.constant 0 : index
    %c0_8 = arith.constant 0 : index
    %23 = vector.load %arg3[%c0_7, %c0_8] : memref<1x128xf32, #tpu.memory_space<vmem>>, vector<1x128xf32>
    %24 = vector.broadcast %23 : vector<1x128xf32> to vector<16x128xf32>
    %25 = arith.addf %22, %24 : vector<16x128xf32>
    %26 = arith.truncf %25 : vector<16x128xf32> to vector<16x128xbf16>
    %c0_9 = arith.constant 0 : index
    %c0_10 = arith.constant 0 : index
    %27 = vector.load %arg4[%c0_9, %c0_10] : memref<16x128xbf16, #tpu.memory_space<vmem>>, vector<16x128xbf16>
    tpu.vector_store %arg4[%c0_9, %c0_10], %26 {strides = array<i32>} : memref<16x128xbf16, #tpu.memory_space<vmem>>, vector<16x128xbf16>,
    return
  }
  func.func @transform_0(%arg0: i32) -> (i32, i32) {
    %c0_i32 = arith.constant 0 : i32
    %c0_i32_0 = arith.constant 0 : i32
    return %arg0, %c0_i32 : i32, i32
  }
  func.func @transform_1(%arg0: i32) -> (i32, i32) {
    %c0_i32 = arith.constant 0 : i32
    %c0_i32_0 = arith.constant 0 : i32
    %c0_i32_1 = arith.constant 0 : i32
    return %c0_i32, %c0_i32_0 : i32, i32
  }
  func.func @transform_2(%arg0: i32) -> (i32, i32) {
    %c0_i32 = arith.constant 0 : i32
    %c0_i32_0 = arith.constant 0 : i32
    %c0_i32_1 = arith.constant 0 : i32
    return %c0_i32, %c0_i32_0 : i32, i32
  }
  func.func @transform_3(%arg0: i32) -> (i32, i32) {
    %c0_i32 = arith.constant 0 : i32
    %c0_i32_0 = arith.constant 0 : i32
    return %arg0, %c0_i32 : i32, i32
  }
}

module attributes {stable_mosaic.version = 11 : i64} {
  func.func @_matmul_bias_act_kernel(%arg0: i32, %arg1: i32, %arg2: i32, %arg3: memref<16x128xbf16, #tpu.memory_space<vmem>>, %arg4: memref<128x384xbf16, #tpu.memory_space<vmem>>, %arg5: memref<1x384xf32, #tpu.memory_space<vmem>>, %arg6: memref<16x384xbf16, #tpu.memory_space<vmem>>, %arg7: memref<16x384xf32, #tpu.memory_space<vmem>>) attributes {dimension_semantics = [#tpu.dimension_semantics<parallel>, #tpu.dimension_semantics<parallel>, #tpu.dimension_semantics<arbitrary>], iteration_bounds = array<i64: 1, 1, 1>, scalar_prefetch = 0 : i64, scratch_operands = 1 : i64, tpu.core_type = #tpu.core_type<tc>, window_params = [{transform_indices = @transform_0, window_bounds = array<i64: 16, 128>}, {transform_indices = @transform_1, window_bounds = array<i64: 128, 384>}, {transform_indices = @transform_2, window_bounds = array<i64: 1, 384>}, {transform_indices = @transform_3, window_bounds = array<i64: 16, 384>}]} {
    %c0_i32 = arith.constant 0 : i32
    %0 = arith.cmpi eq, %arg2, %c0_i32 : i32
    %1 = arith.extui %0 : i1 to i32
    %c0_i32_0 = arith.constant 0 : i32
    %2 = arith.cmpi ne, %1, %c0_i32_0 : i32
    scf.if %2 {
      %cst_10 = arith.constant 0.000000e+00 : f32
      %12 = vector.broadcast %cst_10 : f32 to vector<16x384xf32>
      %c0_11 = arith.constant 0 : index
      %c0_12 = arith.constant 0 : index
      %13 = vector.load %arg7[%c0_11, %c0_12] : memref<16x384xf32, #tpu.memory_space<vmem>>, vector<16x384xf32>
      tpu.vector_store %arg7[%c0_11, %c0_12], %12 {strides = array<i32>} : memref<16x384xf32, #tpu.memory_space<vmem>>, vector<16x384xf32>,
    } else {
    }
    %c0 = arith.constant 0 : index
    %c0_1 = arith.constant 0 : index
    %3 = vector.load %arg7[%c0, %c0_1] : memref<16x384xf32, #tpu.memory_space<vmem>>, vector<16x384xf32>
    %c0_2 = arith.constant 0 : index
    %c0_3 = arith.constant 0 : index
    %4 = vector.load %arg3[%c0_2, %c0_3] : memref<16x128xbf16, #tpu.memory_space<vmem>>, vector<16x128xbf16>
    %c0_4 = arith.constant 0 : index
    %c0_5 = arith.constant 0 : index
    %5 = vector.load %arg4[%c0_4, %c0_5] : memref<128x384xbf16, #tpu.memory_space<vmem>>, vector<128x384xbf16>
    %cst = arith.constant dense<0.000000e+00> : vector<16x384xf32>
    %6 = tpu.matmul %4, %5, %cst {dimension_numbers = #tpu.dot_dimension_numbers<[1], [0], [0], [1], [0, 0, 1, 1], [], []>} : vector<16x128xbf16>, vector<128x384xbf16>, vector<16x384xf32> -> vector<16x384xf32>
    %7 = arith.addf %3, %6 : vector<16x384xf32>
    %c0_6 = arith.constant 0 : index
    %c0_7 = arith.constant 0 : index
    %8 = vector.load %arg7[%c0_6, %c0_7] : memref<16x384xf32, #tpu.memory_space<vmem>>, vector<16x384xf32>
    tpu.vector_store %arg7[%c0_6, %c0_7], %7 {strides = array<i32>} : memref<16x384xf32, #tpu.memory_space<vmem>>, vector<16x384xf32>,
    %c0_i32_8 = arith.constant 0 : i32
    %9 = arith.cmpi eq, %arg2, %c0_i32_8 : i32
    %10 = arith.extui %9 : i1 to i32
    %c0_i32_9 = arith.constant 0 : i32
    %11 = arith.cmpi ne, %10, %c0_i32_9 : i32
    scf.if %11 {
      %c0_10 = arith.constant 0 : index
      %c0_11 = arith.constant 0 : index
      %12 = vector.load %arg7[%c0_10, %c0_11] : memref<16x384xf32, #tpu.memory_space<vmem>>, vector<16x384xf32>
      %c0_12 = arith.constant 0 : index
      %c0_13 = arith.constant 0 : index
      %13 = vector.load %arg5[%c0_12, %c0_13] : memref<1x384xf32, #tpu.memory_space<vmem>>, vector<1x384xf32>
      %14 = vector.broadcast %13 : vector<1x384xf32> to vector<16x384xf32>
      %15 = arith.addf %12, %14 : vector<16x384xf32>
      %16 = arith.truncf %15 : vector<16x384xf32> to vector<16x384xbf16>
      %c0_14 = arith.constant 0 : index
      %c0_15 = arith.constant 0 : index
      %17 = vector.load %arg6[%c0_14, %c0_15] : memref<16x384xbf16, #tpu.memory_space<vmem>>, vector<16x384xbf16>
      tpu.vector_store %arg6[%c0_14, %c0_15], %16 {strides = array<i32>} : memref<16x384xbf16, #tpu.memory_space<vmem>>, vector<16x384xbf16>,
    } else {
    }
    return
  }
  func.func @transform_0(%arg0: i32, %arg1: i32, %arg2: i32) -> (i32, i32) {
    %c0_i32 = arith.constant 0 : i32
    return %arg0, %arg2 : i32, i32
  }
  func.func @transform_1(%arg0: i32, %arg1: i32, %arg2: i32) -> (i32, i32) {
    %c0_i32 = arith.constant 0 : i32
    return %arg2, %arg1 : i32, i32
  }
  func.func @transform_2(%arg0: i32, %arg1: i32, %arg2: i32) -> (i32, i32) {
    %c0_i32 = arith.constant 0 : i32
    %c0_i32_0 = arith.constant 0 : i32
    return %c0_i32, %arg1 : i32, i32
  }
  func.func @transform_3(%arg0: i32, %arg1: i32, %arg2: i32) -> (i32, i32) {
    %c0_i32 = arith.constant 0 : i32
    return %arg0, %arg1 : i32, i32
  }
}

module attributes {stable_mosaic.version = 11 : i64} {
  func.func @_flash_attn_kernel(%arg0: i32, %arg1: i32, %arg2: i32, %arg3: memref<1x8x128xbf16, #tpu.memory_space<vmem>>, %arg4: memref<1x8x128xbf16, #tpu.memory_space<vmem>>, %arg5: memref<1x8x128xbf16, #tpu.memory_space<vmem>>, %arg6: memref<1x1x8xf32, #tpu.memory_space<vmem>>, %arg7: memref<1x8x128xbf16, #tpu.memory_space<vmem>>, %arg8: memref<2x8x1xf32, #tpu.memory_space<vmem>>, %arg9: memref<2x8x1xf32, #tpu.memory_space<vmem>>, %arg10: memref<2x8x64xf32, #tpu.memory_space<vmem>>) attributes {dimension_semantics = [#tpu.dimension_semantics<parallel>, #tpu.dimension_semantics<parallel>, #tpu.dimension_semantics<arbitrary>], iteration_bounds = array<i64: 2, 1, 1>, scalar_prefetch = 0 : i64, scratch_operands = 3 : i64, tpu.core_type = #tpu.core_type<tc>, window_params = [{transform_indices = @transform_0, window_bounds = array<i64: 1, 8, 128>}, {transform_indices = @transform_1, window_bounds = array<i64: 1, 8, 128>}, {transform_indices = @transform_2, window_bounds = array<i64: 1, 8, 128>}, {transform_indices = @transform_3, window_bounds = array<i64: 1, 1, 8>}, {transform_indices = @transform_4, window_bounds = array<i64: 1, 8, 128>}]} {
    %c0_i32 = arith.constant 0 : i32
    %0 = arith.cmpi eq, %arg2, %c0_i32 : i32
    %1 = arith.extui %0 : i1 to i32
    %c0_i32_0 = arith.constant 0 : i32
    %2 = arith.cmpi ne, %1, %c0_i32_0 : i32
    scf.if %2 {
      %cst_66 = arith.constant 0xFF800000 : f32
      %94 = vector.broadcast %cst_66 : f32 to vector<2x8x1xf32>
      %c0_67 = arith.constant 0 : index
      %c0_68 = arith.constant 0 : index
      %c0_69 = arith.constant 0 : index
      %95 = vector.load %arg8[%c0_67, %c0_68, %c0_69] : memref<2x8x1xf32, #tpu.memory_space<vmem>>, vector<2x8x1xf32>
      tpu.vector_store %arg8[%c0_67, %c0_68, %c0_69], %94 {strides = array<i32>} : memref<2x8x1xf32, #tpu.memory_space<vmem>>, vector<2x8x1xf32>,
      %cst_70 = arith.constant 0.000000e+00 : f32
      %96 = vector.broadcast %cst_70 : f32 to vector<2x8x1xf32>
      %c0_71 = arith.constant 0 : index
      %c0_72 = arith.constant 0 : index
      %c0_73 = arith.constant 0 : index
      %97 = vector.load %arg9[%c0_71, %c0_72, %c0_73] : memref<2x8x1xf32, #tpu.memory_space<vmem>>, vector<2x8x1xf32>
      tpu.vector_store %arg9[%c0_71, %c0_72, %c0_73], %96 {strides = array<i32>} : memref<2x8x1xf32, #tpu.memory_space<vmem>>, vector<2x8x1xf32>,
      %cst_74 = arith.constant 0.000000e+00 : f32
      %98 = vector.broadcast %cst_74 : f32 to vector<2x8x64xf32>
      %c0_75 = arith.constant 0 : index
      %c0_76 = arith.constant 0 : index
      %c0_77 = arith.constant 0 : index
      %99 = vector.load %arg10[%c0_75, %c0_76, %c0_77] : memref<2x8x64xf32, #tpu.memory_space<vmem>>, vector<2x8x64xf32>
      tpu.vector_store %arg10[%c0_75, %c0_76, %c0_77], %98 {strides = array<i32>} : memref<2x8x64xf32, #tpu.memory_space<vmem>>, vector<2x8x64xf32>,
    } else {
    }
    %c0 = arith.constant 0 : index
    %c0_1 = arith.constant 0 : index
    %c0_2 = arith.constant 0 : index
    %3 = vector.load %arg6[%c0, %c0_1, %c0_2] : memref<1x1x8xf32, #tpu.memory_space<vmem>>, vector<1x1x8xf32>
    %4 = vector.shape_cast %3 : vector<1x1x8xf32> to vector<1x8xf32>
    %c0_3 = arith.constant 0 : index
    %c0_4 = arith.constant 0 : index
    %c0_5 = arith.constant 0 : index
    %5 = vector.load %arg3[%c0_3, %c0_4, %c0_5] : memref<1x8x128xbf16, #tpu.memory_space<vmem>>, vector<1x8x64xbf16>
    %6 = vector.shape_cast %5 : vector<1x8x64xbf16> to vector<8x64xbf16>
    %cst = arith.constant 1.250000e-01 : bf16
    %7 = vector.broadcast %cst : bf16 to vector<8x64xbf16>
    %8 = arith.mulf %6, %7 : vector<8x64xbf16>
    %c0_6 = arith.constant 0 : index
    %c0_7 = arith.constant 0 : index
    %c0_8 = arith.constant 0 : index
    %9 = vector.load %arg4[%c0_6, %c0_7, %c0_8] : memref<1x8x128xbf16, #tpu.memory_space<vmem>>, vector<1x8x64xbf16>
    %10 = vector.shape_cast %9 : vector<1x8x64xbf16> to vector<8x64xbf16>
    %c0_9 = arith.constant 0 : index
    %c0_10 = arith.constant 0 : index
    %c0_11 = arith.constant 0 : index
    %11 = vector.load %arg5[%c0_9, %c0_10, %c0_11] : memref<1x8x128xbf16, #tpu.memory_space<vmem>>, vector<1x8x64xbf16>
    %12 = vector.shape_cast %11 : vector<1x8x64xbf16> to vector<8x64xbf16>
    %cst_12 = arith.constant dense<0.000000e+00> : vector<8x8xf32>
    %13 = tpu.matmul %8, %10, %cst_12 {dimension_numbers = #tpu.dot_dimension_numbers<[1], [1], [0], [0], [0, 0, 1, 0], [], []>} : vector<8x64xbf16>, vector<8x64xbf16>, vector<8x8xf32> -> vector<8x8xf32>
    %14 = vector.broadcast %4 : vector<1x8xf32> to vector<8x8xf32>
    %15 = arith.addf %13, %14 : vector<8x8xf32>
    %c0_13 = arith.constant 0 : index
    %c0_14 = arith.constant 0 : index
    %c0_15 = arith.constant 0 : index
    %16 = vector.load %arg8[%c0_13, %c0_14, %c0_15] : memref<2x8x1xf32, #tpu.memory_space<vmem>>, vector<1x8x1xf32>
    %17 = vector.shape_cast %16 : vector<1x8x1xf32> to vector<8x1xf32>
    %cst_16 = arith.constant dense<0xFF800000> : vector<8xf32>
    %18 = vector.multi_reduction <maximumf>, %15, %cst_16 [1] : vector<8x8xf32> to vector<8xf32>
    %19 = vector.shape_cast %18 : vector<8xf32> to vector<8x1xf32>
    %20 = arith.maximumf %17, %19 : vector<8x1xf32>
    %21 = arith.subf %17, %20 : vector<8x1xf32>
    %22 = math.exp %21 : vector<8x1xf32>
    %23 = vector.broadcast %20 : vector<8x1xf32> to vector<8x8xf32>
    %24 = arith.subf %15, %23 : vector<8x8xf32>
    %25 = math.exp %24 : vector<8x8xf32>
    %c0_17 = arith.constant 0 : index
    %c0_18 = arith.constant 0 : index
    %c0_19 = arith.constant 0 : index
    %26 = vector.load %arg9[%c0_17, %c0_18, %c0_19] : memref<2x8x1xf32, #tpu.memory_space<vmem>>, vector<1x8x1xf32>
    %27 = vector.shape_cast %26 : vector<1x8x1xf32> to vector<8x1xf32>
    %28 = arith.mulf %22, %27 : vector<8x1xf32>
    %cst_20 = arith.constant dense<0.000000e+00> : vector<8xf32>
    %29 = vector.multi_reduction <add>, %25, %cst_20 [1] : vector<8x8xf32> to vector<8xf32>
    %30 = vector.shape_cast %29 : vector<8xf32> to vector<8x1xf32>
    %31 = arith.addf %28, %30 : vector<8x1xf32>
    %c0_21 = arith.constant 0 : index
    %c0_22 = arith.constant 0 : index
    %c0_23 = arith.constant 0 : index
    %32 = vector.load %arg9[%c0_21, %c0_22, %c0_23] : memref<2x8x1xf32, #tpu.memory_space<vmem>>, vector<1x8x1xf32>
    %33 = vector.shape_cast %32 : vector<1x8x1xf32> to vector<8x1xf32>
    %34 = vector.shape_cast %31 : vector<8x1xf32> to vector<1x8x1xf32>
    tpu.vector_store %arg9[%c0_21, %c0_22, %c0_23], %34 {strides = array<i32>} : memref<2x8x1xf32, #tpu.memory_space<vmem>>, vector<1x8x1xf32>,
    %c0_24 = arith.constant 0 : index
    %c0_25 = arith.constant 0 : index
    %c0_26 = arith.constant 0 : index
    %35 = vector.load %arg10[%c0_24, %c0_25, %c0_26] : memref<2x8x64xf32, #tpu.memory_space<vmem>>, vector<1x8x64xf32>
    %36 = vector.shape_cast %35 : vector<1x8x64xf32> to vector<8x64xf32>
    %37 = vector.broadcast %22 : vector<8x1xf32> to vector<8x64xf32>
    %38 = arith.mulf %37, %36 : vector<8x64xf32>
    %39 = arith.truncf %25 : vector<8x8xf32> to vector<8x8xbf16>
    %cst_27 = arith.constant dense<0.000000e+00> : vector<8x64xf32>
    %40 = tpu.matmul %39, %12, %cst_27 {dimension_numbers = #tpu.dot_dimension_numbers<[1], [0], [0], [1], [0, 0, 1, 1], [], []>} : vector<8x8xbf16>, vector<8x64xbf16>, vector<8x64xf32> -> vector<8x64xf32>
    %41 = arith.addf %38, %40 : vector<8x64xf32>
    %c0_28 = arith.constant 0 : index
    %c0_29 = arith.constant 0 : index
    %c0_30 = arith.constant 0 : index
    %42 = vector.load %arg10[%c0_28, %c0_29, %c0_30] : memref<2x8x64xf32, #tpu.memory_space<vmem>>, vector<1x8x64xf32>
    %43 = vector.shape_cast %42 : vector<1x8x64xf32> to vector<8x64xf32>
    %44 = vector.shape_cast %41 : vector<8x64xf32> to vector<1x8x64xf32>
    tpu.vector_store %arg10[%c0_28, %c0_29, %c0_30], %44 {strides = array<i32>} : memref<2x8x64xf32, #tpu.memory_space<vmem>>, vector<1x8x64xf32>,
    %c0_31 = arith.constant 0 : index
    %c0_32 = arith.constant 0 : index
    %c0_33 = arith.constant 0 : index
    %45 = vector.load %arg8[%c0_31, %c0_32, %c0_33] : memref<2x8x1xf32, #tpu.memory_space<vmem>>, vector<1x8x1xf32>
    %46 = vector.shape_cast %45 : vector<1x8x1xf32> to vector<8x1xf32>
    %47 = vector.shape_cast %20 : vector<8x1xf32> to vector<1x8x1xf32>
    tpu.vector_store %arg8[%c0_31, %c0_32, %c0_33], %47 {strides = array<i32>} : memref<2x8x1xf32, #tpu.memory_space<vmem>>, vector<1x8x1xf32>,
    %c0_34 = arith.constant 0 : index
    %c0_35 = arith.constant 0 : index
    %c64 = arith.constant 64 : index
    %48 = vector.load %arg3[%c0_34, %c0_35, %c64] : memref<1x8x128xbf16, #tpu.memory_space<vmem>>, vector<1x8x64xbf16>
    %49 = vector.shape_cast %48 : vector<1x8x64xbf16> to vector<8x64xbf16>
    %cst_36 = arith.constant 1.250000e-01 : bf16
    %50 = vector.broadcast %cst_36 : bf16 to vector<8x64xbf16>
    %51 = arith.mulf %49, %50 : vector<8x64xbf16>
    %c0_37 = arith.constant 0 : index
    %c0_38 = arith.constant 0 : index
    %c64_39 = arith.constant 64 : index
    %52 = vector.load %arg4[%c0_37, %c0_38, %c64_39] : memref<1x8x128xbf16, #tpu.memory_space<vmem>>, vector<1x8x64xbf16>
    %53 = vector.shape_cast %52 : vector<1x8x64xbf16> to vector<8x64xbf16>
    %c0_40 = arith.constant 0 : index
    %c0_41 = arith.constant 0 : index
    %c64_42 = arith.constant 64 : index
    %54 = vector.load %arg5[%c0_40, %c0_41, %c64_42] : memref<1x8x128xbf16, #tpu.memory_space<vmem>>, vector<1x8x64xbf16>
    %55 = vector.shape_cast %54 : vector<1x8x64xbf16> to vector<8x64xbf16>
    %cst_43 = arith.constant dense<0.000000e+00> : vector<8x8xf32>
    %56 = tpu.matmul %51, %53, %cst_43 {dimension_numbers = #tpu.dot_dimension_numbers<[1], [1], [0], [0], [0, 0, 1, 0], [], []>} : vector<8x64xbf16>, vector<8x64xbf16>, vector<8x8xf32> -> vector<8x8xf32>
    %57 = vector.broadcast %4 : vector<1x8xf32> to vector<8x8xf32>
    %58 = arith.addf %56, %57 : vector<8x8xf32>
    %c1 = arith.constant 1 : index
    %c0_44 = arith.constant 0 : index
    %c0_45 = arith.constant 0 : index
    %59 = vector.load %arg8[%c1, %c0_44, %c0_45] : memref<2x8x1xf32, #tpu.memory_space<vmem>>, vector<1x8x1xf32>
    %60 = vector.shape_cast %59 : vector<1x8x1xf32> to vector<8x1xf32>
    %cst_46 = arith.constant dense<0xFF800000> : vector<8xf32>
    %61 = vector.multi_reduction <maximumf>, %58, %cst_46 [1] : vector<8x8xf32> to vector<8xf32>
    %62 = vector.shape_cast %61 : vector<8xf32> to vector<8x1xf32>
    %63 = arith.maximumf %60, %62 : vector<8x1xf32>
    %64 = arith.subf %60, %63 : vector<8x1xf32>
    %65 = math.exp %64 : vector<8x1xf32>
    %66 = vector.broadcast %63 : vector<8x1xf32> to vector<8x8xf32>
    %67 = arith.subf %58, %66 : vector<8x8xf32>
    %68 = math.exp %67 : vector<8x8xf32>
    %c1_47 = arith.constant 1 : index
    %c0_48 = arith.constant 0 : index
    %c0_49 = arith.constant 0 : index
    %69 = vector.load %arg9[%c1_47, %c0_48, %c0_49] : memref<2x8x1xf32, #tpu.memory_space<vmem>>, vector<1x8x1xf32>
    %70 = vector.shape_cast %69 : vector<1x8x1xf32> to vector<8x1xf32>
    %71 = arith.mulf %65, %70 : vector<8x1xf32>
    %cst_50 = arith.constant dense<0.000000e+00> : vector<8xf32>
    %72 = vector.multi_reduction <add>, %68, %cst_50 [1] : vector<8x8xf32> to vector<8xf32>
    %73 = vector.shape_cast %72 : vector<8xf32> to vector<8x1xf32>
    %74 = arith.addf %71, %73 : vector<8x1xf32>
    %c1_51 = arith.constant 1 : index
    %c0_52 = arith.constant 0 : index
    %c0_53 = arith.constant 0 : index
    %75 = vector.load %arg9[%c1_51, %c0_52, %c0_53] : memref<2x8x1xf32, #tpu.memory_space<vmem>>, vector<1x8x1xf32>
    %76 = vector.shape_cast %75 : vector<1x8x1xf32> to vector<8x1xf32>
    %77 = vector.shape_cast %74 : vector<8x1xf32> to vector<1x8x1xf32>
    tpu.vector_store %arg9[%c1_51, %c0_52, %c0_53], %77 {strides = array<i32>} : memref<2x8x1xf32, #tpu.memory_space<vmem>>, vector<1x8x1xf32>,
    %c1_54 = arith.constant 1 : index
    %c0_55 = arith.constant 0 : index
    %c0_56 = arith.constant 0 : index
    %78 = vector.load %arg10[%c1_54, %c0_55, %c0_56] : memref<2x8x64xf32, #tpu.memory_space<vmem>>, vector<1x8x64xf32>
    %79 = vector.shape_cast %78 : vector<1x8x64xf32> to vector<8x64xf32>
    %80 = vector.broadcast %65 : vector<8x1xf32> to vector<8x64xf32>
    %81 = arith.mulf %80, %79 : vector<8x64xf32>
    %82 = arith.truncf %68 : vector<8x8xf32> to vector<8x8xbf16>
    %cst_57 = arith.constant dense<0.000000e+00> : vector<8x64xf32>
    %83 = tpu.matmul %82, %55, %cst_57 {dimension_numbers = #tpu.dot_dimension_numbers<[1], [0], [0], [1], [0, 0, 1, 1], [], []>} : vector<8x8xbf16>, vector<8x64xbf16>, vector<8x64xf32> -> vector<8x64xf32>
    %84 = arith.addf %81, %83 : vector<8x64xf32>
    %c1_58 = arith.constant 1 : index
    %c0_59 = arith.constant 0 : index
    %c0_60 = arith.constant 0 : index
    %85 = vector.load %arg10[%c1_58, %c0_59, %c0_60] : memref<2x8x64xf32, #tpu.memory_space<vmem>>, vector<1x8x64xf32>
    %86 = vector.shape_cast %85 : vector<1x8x64xf32> to vector<8x64xf32>
    %87 = vector.shape_cast %84 : vector<8x64xf32> to vector<1x8x64xf32>
    tpu.vector_store %arg10[%c1_58, %c0_59, %c0_60], %87 {strides = array<i32>} : memref<2x8x64xf32, #tpu.memory_space<vmem>>, vector<1x8x64xf32>,
    %c1_61 = arith.constant 1 : index
    %c0_62 = arith.constant 0 : index
    %c0_63 = arith.constant 0 : index
    %88 = vector.load %arg8[%c1_61, %c0_62, %c0_63] : memref<2x8x1xf32, #tpu.memory_space<vmem>>, vector<1x8x1xf32>
    %89 = vector.shape_cast %88 : vector<1x8x1xf32> to vector<8x1xf32>
    %90 = vector.shape_cast %63 : vector<8x1xf32> to vector<1x8x1xf32>
    tpu.vector_store %arg8[%c1_61, %c0_62, %c0_63], %90 {strides = array<i32>} : memref<2x8x1xf32, #tpu.memory_space<vmem>>, vector<1x8x1xf32>,
    %c0_i32_64 = arith.constant 0 : i32
    %91 = arith.cmpi eq, %arg2, %c0_i32_64 : i32
    %92 = arith.extui %91 : i1 to i32
    %c0_i32_65 = arith.constant 0 : i32
    %93 = arith.cmpi ne, %92, %c0_i32_65 : i32
    scf.if %93 {
      %c0_66 = arith.constant 0 : index
      %c0_67 = arith.constant 0 : index
      %c0_68 = arith.constant 0 : index
      %94 = vector.load %arg9[%c0_66, %c0_67, %c0_68] : memref<2x8x1xf32, #tpu.memory_space<vmem>>, vector<1x8x1xf32>
      %95 = vector.shape_cast %94 : vector<1x8x1xf32> to vector<8x1xf32>
      %96 = tpu.reciprocal %95 {approx = true} : vector<8x1xf32> -> vector<8x1xf32>
      %c0_69 = arith.constant 0 : index
      %c0_70 = arith.constant 0 : index
      %c0_71 = arith.constant 0 : index
      %97 = vector.load %arg10[%c0_69, %c0_70, %c0_71] : memref<2x8x64xf32, #tpu.memory_space<vmem>>, vector<1x8x64xf32>
      %98 = vector.shape_cast %97 : vector<1x8x64xf32> to vector<8x64xf32>
      %99 = vector.broadcast %96 : vector<8x1xf32> to vector<8x64xf32>
      %100 = arith.mulf %98, %99 : vector<8x64xf32>
      %c1_72 = arith.constant 1 : index
      %c0_73 = arith.constant 0 : index
      %c0_74 = arith.constant 0 : index
      %101 = vector.load %arg9[%c1_72, %c0_73, %c0_74] : memref<2x8x1xf32, #tpu.memory_space<vmem>>, vector<1x8x1xf32>
      %102 = vector.shape_cast %101 : vector<1x8x1xf32> to vector<8x1xf32>
      %103 = tpu.reciprocal %102 {approx = true} : vector<8x1xf32> -> vector<8x1xf32>
      %c1_75 = arith.constant 1 : index
      %c0_76 = arith.constant 0 : index
      %c0_77 = arith.constant 0 : index
      %104 = vector.load %arg10[%c1_75, %c0_76, %c0_77] : memref<2x8x64xf32, #tpu.memory_space<vmem>>, vector<1x8x64xf32>
      %105 = vector.shape_cast %104 : vector<1x8x64xf32> to vector<8x64xf32>
      %106 = vector.broadcast %103 : vector<8x1xf32> to vector<8x64xf32>
      %107 = arith.mulf %105, %106 : vector<8x64xf32>
      %108 = tpu.concatenate %100, %107 in 1 : vector<8x64xf32>, vector<8x64xf32> -> vector<8x128xf32>
      %109 = arith.truncf %108 : vector<8x128xf32> to vector<8x128xbf16>
      %c0_78 = arith.constant 0 : index
      %c0_79 = arith.constant 0 : index
      %c0_80 = arith.constant 0 : index
      %110 = vector.load %arg7[%c0_78, %c0_79, %c0_80] : memref<1x8x128xbf16, #tpu.memory_space<vmem>>, vector<1x8x128xbf16>
      %111 = vector.shape_cast %110 : vector<1x8x128xbf16> to vector<8x128xbf16>
      %112 = vector.shape_cast %109 : vector<8x128xbf16> to vector<1x8x128xbf16>
      tpu.vector_store %arg7[%c0_78, %c0_79, %c0_80], %112 {strides = array<i32>} : memref<1x8x128xbf16, #tpu.memory_space<vmem>>, vector<1x8x128xbf16>,
    } else {
    }
    return
  }
  func.func @transform_0(%arg0: i32, %arg1: i32, %arg2: i32) -> (i32, i32, i32) {
    %c0_i32 = arith.constant 0 : i32
    %c0_i32_0 = arith.constant 0 : i32
    return %arg0, %arg1, %c0_i32 : i32, i32, i32
  }
  func.func @transform_1(%arg0: i32, %arg1: i32, %arg2: i32) -> (i32, i32, i32) {
    %c1_i32 = arith.constant 1 : i32
    %c0_i32 = arith.constant 0 : i32
    return %arg0, %arg2, %c1_i32 : i32, i32, i32
  }
  func.func @transform_2(%arg0: i32, %arg1: i32, %arg2: i32) -> (i32, i32, i32) {
    %c2_i32 = arith.constant 2 : i32
    %c0_i32 = arith.constant 0 : i32
    return %arg0, %arg2, %c2_i32 : i32, i32, i32
  }
  func.func @transform_3(%arg0: i32, %arg1: i32, %arg2: i32) -> (i32, i32, i32) {
    %c0_i32 = arith.constant 0 : i32
    %c0_i32_0 = arith.constant 0 : i32
    return %arg0, %c0_i32, %arg2 : i32, i32, i32
  }
  func.func @transform_4(%arg0: i32, %arg1: i32, %arg2: i32) -> (i32, i32, i32) {
    %c0_i32 = arith.constant 0 : i32
    %c0_i32_0 = arith.constant 0 : i32
    return %arg0, %arg1, %c0_i32 : i32, i32, i32
  }
}

module attributes {stable_mosaic.version = 11 : i64} {
  func.func @_matmul_res_ln_kernel(%arg0: i32, %arg1: i32, %arg2: memref<16x128xbf16, #tpu.memory_space<vmem>>, %arg3: memref<128x128xbf16, #tpu.memory_space<vmem>>, %arg4: memref<1x128xf32, #tpu.memory_space<vmem>>, %arg5: memref<16x128xbf16, #tpu.memory_space<vmem>>, %arg6: memref<1x128xf32, #tpu.memory_space<vmem>>, %arg7: memref<1x128xf32, #tpu.memory_space<vmem>>, %arg8: memref<16x128xbf16, #tpu.memory_space<vmem>>, %arg9: memref<16x128xf32, #tpu.memory_space<vmem>>) attributes {dimension_semantics = [#tpu.dimension_semantics<parallel>, #tpu.dimension_semantics<arbitrary>], iteration_bounds = array<i64: 1, 1>, scalar_prefetch = 0 : i64, scratch_operands = 1 : i64, tpu.core_type = #tpu.core_type<tc>, window_params = [{transform_indices = @transform_0, window_bounds = array<i64: 16, 128>}, {transform_indices = @transform_1, window_bounds = array<i64: 128, 128>}, {pipeline_mode = #tpu.pipeline_mode<synchronous>, transform_indices = @transform_2, window_bounds = array<i64: 1, 128>}, {transform_indices = @transform_3, window_bounds = array<i64: 16, 128>}, {pipeline_mode = #tpu.pipeline_mode<synchronous>, transform_indices = @transform_4, window_bounds = array<i64: 1, 128>}, {pipeline_mode = #tpu.pipeline_mode<synchronous>, transform_indices = @transform_5, window_bounds = array<i64: 1, 128>}, {transform_indices = @transform_6, window_bounds = array<i64: 16, 128>}]} {
    %c0_i32 = arith.constant 0 : i32
    %0 = arith.cmpi eq, %arg1, %c0_i32 : i32
    %1 = arith.extui %0 : i1 to i32
    %c0_i32_0 = arith.constant 0 : i32
    %2 = arith.cmpi ne, %1, %c0_i32_0 : i32
    scf.if %2 {
      %cst_10 = arith.constant 0.000000e+00 : f32
      %12 = vector.broadcast %cst_10 : f32 to vector<16x128xf32>
      %c0_11 = arith.constant 0 : index
      %c0_12 = arith.constant 0 : index
      %13 = vector.load %arg9[%c0_11, %c0_12] : memref<16x128xf32, #tpu.memory_space<vmem>>, vector<16x128xf32>
      tpu.vector_store %arg9[%c0_11, %c0_12], %12 {strides = array<i32>} : memref<16x128xf32, #tpu.memory_space<vmem>>, vector<16x128xf32>,
    } else {
    }
    %c0 = arith.constant 0 : index
    %c0_1 = arith.constant 0 : index
    %3 = vector.load %arg9[%c0, %c0_1] : memref<16x128xf32, #tpu.memory_space<vmem>>, vector<16x128xf32>
    %c0_2 = arith.constant 0 : index
    %c0_3 = arith.constant 0 : index
    %4 = vector.load %arg2[%c0_2, %c0_3] : memref<16x128xbf16, #tpu.memory_space<vmem>>, vector<16x128xbf16>
    %c0_4 = arith.constant 0 : index
    %c0_5 = arith.constant 0 : index
    %5 = vector.load %arg3[%c0_4, %c0_5] : memref<128x128xbf16, #tpu.memory_space<vmem>>, vector<128x128xbf16>
    %cst = arith.constant dense<0.000000e+00> : vector<16x128xf32>
    %6 = tpu.matmul %4, %5, %cst {dimension_numbers = #tpu.dot_dimension_numbers<[1], [0], [0], [1], [0, 0, 1, 1], [], []>} : vector<16x128xbf16>, vector<128x128xbf16>, vector<16x128xf32> -> vector<16x128xf32>
    %7 = arith.addf %3, %6 : vector<16x128xf32>
    %c0_6 = arith.constant 0 : index
    %c0_7 = arith.constant 0 : index
    %8 = vector.load %arg9[%c0_6, %c0_7] : memref<16x128xf32, #tpu.memory_space<vmem>>, vector<16x128xf32>
    tpu.vector_store %arg9[%c0_6, %c0_7], %7 {strides = array<i32>} : memref<16x128xf32, #tpu.memory_space<vmem>>, vector<16x128xf32>,
    %c0_i32_8 = arith.constant 0 : i32
    %9 = arith.cmpi eq, %arg1, %c0_i32_8 : i32
    %10 = arith.extui %9 : i1 to i32
    %c0_i32_9 = arith.constant 0 : i32
    %11 = arith.cmpi ne, %10, %c0_i32_9 : i32
    scf.if %11 {
      %c0_10 = arith.constant 0 : index
      %c0_11 = arith.constant 0 : index
      %12 = vector.load %arg9[%c0_10, %c0_11] : memref<16x128xf32, #tpu.memory_space<vmem>>, vector<16x128xf32>
      %c0_12 = arith.constant 0 : index
      %c0_13 = arith.constant 0 : index
      %13 = vector.load %arg4[%c0_12, %c0_13] : memref<1x128xf32, #tpu.memory_space<vmem>>, vector<1x128xf32>
      %14 = vector.broadcast %13 : vector<1x128xf32> to vector<16x128xf32>
      %15 = arith.addf %12, %14 : vector<16x128xf32>
      %c0_14 = arith.constant 0 : index
      %c0_15 = arith.constant 0 : index
      %16 = vector.load %arg5[%c0_14, %c0_15] : memref<16x128xbf16, #tpu.memory_space<vmem>>, vector<16x128xbf16>
      %17 = arith.extf %16 : vector<16x128xbf16> to vector<16x128xf32>
      %18 = arith.addf %15, %17 : vector<16x128xf32>
      %cst_16 = arith.constant dense<0.000000e+00> : vector<16xf32>
      %19 = vector.multi_reduction <add>, %18, %cst_16 [1] : vector<16x128xf32> to vector<16xf32>
      %20 = vector.shape_cast %19 : vector<16xf32> to vector<16x1xf32>
      %cst_17 = arith.constant 1.280000e+02 : f32
      %21 = vector.broadcast %cst_17 : f32 to vector<16x1xf32>
      %22 = arith.divf %20, %21 : vector<16x1xf32>
      %23 = vector.broadcast %22 : vector<16x1xf32> to vector<16x128xf32>
      %24 = arith.subf %18, %23 : vector<16x128xf32>
      %25 = arith.mulf %24, %24 : vector<16x128xf32>
      %cst_18 = arith.constant dense<0.000000e+00> : vector<16xf32>
      %26 = vector.multi_reduction <add>, %25, %cst_18 [1] : vector<16x128xf32> to vector<16xf32>
      %27 = vector.shape_cast %26 : vector<16xf32> to vector<16x1xf32>
      %cst_19 = arith.constant 1.280000e+02 : f32
      %28 = vector.broadcast %cst_19 : f32 to vector<16x1xf32>
      %29 = arith.divf %27, %28 : vector<16x1xf32>
      %30 = vector.broadcast %22 : vector<16x1xf32> to vector<16x128xf32>
      %31 = arith.subf %18, %30 : vector<16x128xf32>
      %cst_20 = arith.constant 9.99999996E-13 : f32
      %32 = vector.broadcast %cst_20 : f32 to vector<16x1xf32>
      %33 = arith.addf %29, %32 : vector<16x1xf32>
      %34 = math.rsqrt %33 : vector<16x1xf32>
      %35 = vector.broadcast %34 : vector<16x1xf32> to vector<16x128xf32>
      %36 = arith.mulf %31, %35 : vector<16x128xf32>
      %c0_21 = arith.constant 0 : index
      %c0_22 = arith.constant 0 : index
      %37 = vector.load %arg6[%c0_21, %c0_22] : memref<1x128xf32, #tpu.memory_space<vmem>>, vector<1x128xf32>
      %38 = vector.broadcast %37 : vector<1x128xf32> to vector<16x128xf32>
      %39 = arith.mulf %36, %38 : vector<16x128xf32>
      %c0_23 = arith.constant 0 : index
      %c0_24 = arith.constant 0 : index
      %40 = vector.load %arg7[%c0_23, %c0_24] : memref<1x128xf32, #tpu.memory_space<vmem>>, vector<1x128xf32>
      %41 = vector.broadcast %40 : vector<1x128xf32> to vector<16x128xf32>
      %42 = arith.addf %39, %41 : vector<16x128xf32>
      %43 = arith.truncf %42 : vector<16x128xf32> to vector<16x128xbf16>
      %c0_25 = arith.constant 0 : index
      %c0_26 = arith.constant 0 : index
      %44 = vector.load %arg8[%c0_25, %c0_26] : memref<16x128xbf16, #tpu.memory_space<vmem>>, vector<16x128xbf16>
      tpu.vector_store %arg8[%c0_25, %c0_26], %43 {strides = array<i32>} : memref<16x128xbf16, #tpu.memory_space<vmem>>, vector<16x128xbf16>,
    } else {
    }
    return
  }
  func.func @transform_0(%arg0: i32, %arg1: i32) -> (i32, i32) {
    %c0_i32 = arith.constant 0 : i32
    return %arg0, %arg1 : i32, i32
  }
  func.func @transform_1(%arg0: i32, %arg1: i32) -> (i32, i32) {
    %c0_i32 = arith.constant 0 : i32
    %c0_i32_0 = arith.constant 0 : i32
    return %arg1, %c0_i32 : i32, i32
  }
  func.func @transform_2(%arg0: i32, %arg1: i32) -> (i32, i32) {
    %c0_i32 = arith.constant 0 : i32
    %c0_i32_0 = arith.constant 0 : i32
    %c0_i32_1 = arith.constant 0 : i32
    return %c0_i32, %c0_i32_0 : i32, i32
  }
  func.func @transform_3(%arg0: i32, %arg1: i32) -> (i32, i32) {
    %c0_i32 = arith.constant 0 : i32
    %c0_i32_0 = arith.constant 0 : i32
    return %arg0, %c0_i32 : i32, i32
  }
  func.func @transform_4(%arg0: i32, %arg1: i32) -> (i32, i32) {
    %c0_i32 = arith.constant 0 : i32
    %c0_i32_0 = arith.constant 0 : i32
    %c0_i32_1 = arith.constant 0 : i32
    return %c0_i32, %c0_i32_0 : i32, i32
  }
  func.func @transform_5(%arg0: i32, %arg1: i32) -> (i32, i32) {
    %c0_i32 = arith.constant 0 : i32
    %c0_i32_0 = arith.constant 0 : i32
    %c0_i32_1 = arith.constant 0 : i32
    return %c0_i32, %c0_i32_0 : i32, i32
  }
  func.func @transform_6(%arg0: i32, %arg1: i32) -> (i32, i32) {
    %c0_i32 = arith.constant 0 : i32
    %c0_i32_0 = arith.constant 0 : i32
    return %arg0, %c0_i32 : i32, i32
  }
}

module attributes {stable_mosaic.version = 11 : i64} {
  func.func @_matmul_res_ln_kernel(%arg0: i32, %arg1: i32, %arg2: memref<16x256xbf16, #tpu.memory_space<vmem>>, %arg3: memref<256x128xbf16, #tpu.memory_space<vmem>>, %arg4: memref<1x128xf32, #tpu.memory_space<vmem>>, %arg5: memref<16x128xbf16, #tpu.memory_space<vmem>>, %arg6: memref<1x128xf32, #tpu.memory_space<vmem>>, %arg7: memref<1x128xf32, #tpu.memory_space<vmem>>, %arg8: memref<16x128xbf16, #tpu.memory_space<vmem>>, %arg9: memref<16x128xf32, #tpu.memory_space<vmem>>) attributes {dimension_semantics = [#tpu.dimension_semantics<parallel>, #tpu.dimension_semantics<arbitrary>], iteration_bounds = array<i64: 1, 1>, scalar_prefetch = 0 : i64, scratch_operands = 1 : i64, tpu.core_type = #tpu.core_type<tc>, window_params = [{transform_indices = @transform_0, window_bounds = array<i64: 16, 256>}, {transform_indices = @transform_1, window_bounds = array<i64: 256, 128>}, {pipeline_mode = #tpu.pipeline_mode<synchronous>, transform_indices = @transform_2, window_bounds = array<i64: 1, 128>}, {transform_indices = @transform_3, window_bounds = array<i64: 16, 128>}, {pipeline_mode = #tpu.pipeline_mode<synchronous>, transform_indices = @transform_4, window_bounds = array<i64: 1, 128>}, {pipeline_mode = #tpu.pipeline_mode<synchronous>, transform_indices = @transform_5, window_bounds = array<i64: 1, 128>}, {transform_indices = @transform_6, window_bounds = array<i64: 16, 128>}]} {
    %c0_i32 = arith.constant 0 : i32
    %0 = arith.cmpi eq, %arg1, %c0_i32 : i32
    %1 = arith.extui %0 : i1 to i32
    %c0_i32_0 = arith.constant 0 : i32
    %2 = arith.cmpi ne, %1, %c0_i32_0 : i32
    scf.if %2 {
      %cst_10 = arith.constant 0.000000e+00 : f32
      %12 = vector.broadcast %cst_10 : f32 to vector<16x128xf32>
      %c0_11 = arith.constant 0 : index
      %c0_12 = arith.constant 0 : index
      %13 = vector.load %arg9[%c0_11, %c0_12] : memref<16x128xf32, #tpu.memory_space<vmem>>, vector<16x128xf32>
      tpu.vector_store %arg9[%c0_11, %c0_12], %12 {strides = array<i32>} : memref<16x128xf32, #tpu.memory_space<vmem>>, vector<16x128xf32>,
    } else {
    }
    %c0 = arith.constant 0 : index
    %c0_1 = arith.constant 0 : index
    %3 = vector.load %arg9[%c0, %c0_1] : memref<16x128xf32, #tpu.memory_space<vmem>>, vector<16x128xf32>
    %c0_2 = arith.constant 0 : index
    %c0_3 = arith.constant 0 : index
    %4 = vector.load %arg2[%c0_2, %c0_3] : memref<16x256xbf16, #tpu.memory_space<vmem>>, vector<16x256xbf16>
    %c0_4 = arith.constant 0 : index
    %c0_5 = arith.constant 0 : index
    %5 = vector.load %arg3[%c0_4, %c0_5] : memref<256x128xbf16, #tpu.memory_space<vmem>>, vector<256x128xbf16>
    %cst = arith.constant dense<0.000000e+00> : vector<16x128xf32>
    %6 = tpu.matmul %4, %5, %cst {dimension_numbers = #tpu.dot_dimension_numbers<[1], [0], [0], [1], [0, 0, 1, 1], [], []>} : vector<16x256xbf16>, vector<256x128xbf16>, vector<16x128xf32> -> vector<16x128xf32>
    %7 = arith.addf %3, %6 : vector<16x128xf32>
    %c0_6 = arith.constant 0 : index
    %c0_7 = arith.constant 0 : index
    %8 = vector.load %arg9[%c0_6, %c0_7] : memref<16x128xf32, #tpu.memory_space<vmem>>, vector<16x128xf32>
    tpu.vector_store %arg9[%c0_6, %c0_7], %7 {strides = array<i32>} : memref<16x128xf32, #tpu.memory_space<vmem>>, vector<16x128xf32>,
    %c0_i32_8 = arith.constant 0 : i32
    %9 = arith.cmpi eq, %arg1, %c0_i32_8 : i32
    %10 = arith.extui %9 : i1 to i32
    %c0_i32_9 = arith.constant 0 : i32
    %11 = arith.cmpi ne, %10, %c0_i32_9 : i32
    scf.if %11 {
      %c0_10 = arith.constant 0 : index
      %c0_11 = arith.constant 0 : index
      %12 = vector.load %arg9[%c0_10, %c0_11] : memref<16x128xf32, #tpu.memory_space<vmem>>, vector<16x128xf32>
      %c0_12 = arith.constant 0 : index
      %c0_13 = arith.constant 0 : index
      %13 = vector.load %arg4[%c0_12, %c0_13] : memref<1x128xf32, #tpu.memory_space<vmem>>, vector<1x128xf32>
      %14 = vector.broadcast %13 : vector<1x128xf32> to vector<16x128xf32>
      %15 = arith.addf %12, %14 : vector<16x128xf32>
      %c0_14 = arith.constant 0 : index
      %c0_15 = arith.constant 0 : index
      %16 = vector.load %arg5[%c0_14, %c0_15] : memref<16x128xbf16, #tpu.memory_space<vmem>>, vector<16x128xbf16>
      %17 = arith.extf %16 : vector<16x128xbf16> to vector<16x128xf32>
      %18 = arith.addf %15, %17 : vector<16x128xf32>
      %cst_16 = arith.constant dense<0.000000e+00> : vector<16xf32>
      %19 = vector.multi_reduction <add>, %18, %cst_16 [1] : vector<16x128xf32> to vector<16xf32>
      %20 = vector.shape_cast %19 : vector<16xf32> to vector<16x1xf32>
      %cst_17 = arith.constant 1.280000e+02 : f32
      %21 = vector.broadcast %cst_17 : f32 to vector<16x1xf32>
      %22 = arith.divf %20, %21 : vector<16x1xf32>
      %23 = vector.broadcast %22 : vector<16x1xf32> to vector<16x128xf32>
      %24 = arith.subf %18, %23 : vector<16x128xf32>
      %25 = arith.mulf %24, %24 : vector<16x128xf32>
      %cst_18 = arith.constant dense<0.000000e+00> : vector<16xf32>
      %26 = vector.multi_reduction <add>, %25, %cst_18 [1] : vector<16x128xf32> to vector<16xf32>
      %27 = vector.shape_cast %26 : vector<16xf32> to vector<16x1xf32>
      %cst_19 = arith.constant 1.280000e+02 : f32
      %28 = vector.broadcast %cst_19 : f32 to vector<16x1xf32>
      %29 = arith.divf %27, %28 : vector<16x1xf32>
      %30 = vector.broadcast %22 : vector<16x1xf32> to vector<16x128xf32>
      %31 = arith.subf %18, %30 : vector<16x128xf32>
      %cst_20 = arith.constant 9.99999996E-13 : f32
      %32 = vector.broadcast %cst_20 : f32 to vector<16x1xf32>
      %33 = arith.addf %29, %32 : vector<16x1xf32>
      %34 = math.rsqrt %33 : vector<16x1xf32>
      %35 = vector.broadcast %34 : vector<16x1xf32> to vector<16x128xf32>
      %36 = arith.mulf %31, %35 : vector<16x128xf32>
      %c0_21 = arith.constant 0 : index
      %c0_22 = arith.constant 0 : index
      %37 = vector.load %arg6[%c0_21, %c0_22] : memref<1x128xf32, #tpu.memory_space<vmem>>, vector<1x128xf32>
      %38 = vector.broadcast %37 : vector<1x128xf32> to vector<16x128xf32>
      %39 = arith.mulf %36, %38 : vector<16x128xf32>
      %c0_23 = arith.constant 0 : index
      %c0_24 = arith.constant 0 : index
      %40 = vector.load %arg7[%c0_23, %c0_24] : memref<1x128xf32, #tpu.memory_space<vmem>>, vector<1x128xf32>
      %41 = vector.broadcast %40 : vector<1x128xf32> to vector<16x128xf32>
      %42 = arith.addf %39, %41 : vector<16x128xf32>
      %43 = arith.truncf %42 : vector<16x128xf32> to vector<16x128xbf16>
      %c0_25 = arith.constant 0 : index
      %c0_26 = arith.constant 0 : index
      %44 = vector.load %arg8[%c0_25, %c0_26] : memref<16x128xbf16, #tpu.memory_space<vmem>>, vector<16x128xbf16>
      tpu.vector_store %arg8[%c0_25, %c0_26], %43 {strides = array<i32>} : memref<16x128xbf16, #tpu.memory_space<vmem>>, vector<16x128xbf16>,
    } else {
    }
    return
  }
  func.func @transform_0(%arg0: i32, %arg1: i32) -> (i32, i32) {
    %c0_i32 = arith.constant 0 : i32
    return %arg0, %arg1 : i32, i32
  }
  func.func @transform_1(%arg0: i32, %arg1: i32) -> (i32, i32) {
    %c0_i32 = arith.constant 0 : i32
    %c0_i32_0 = arith.constant 0 : i32
    return %arg1, %c0_i32 : i32, i32
  }
  func.func @transform_2(%arg0: i32, %arg1: i32) -> (i32, i32) {
    %c0_i32 = arith.constant 0 : i32
    %c0_i32_0 = arith.constant 0 : i32
    %c0_i32_1 = arith.constant 0 : i32
    return %c0_i32, %c0_i32_0 : i32, i32
  }
  func.func @transform_3(%arg0: i32, %arg1: i32) -> (i32, i32) {
    %c0_i32 = arith.constant 0 : i32
    %c0_i32_0 = arith.constant 0 : i32
    return %arg0, %c0_i32 : i32, i32
  }
  func.func @transform_4(%arg0: i32, %arg1: i32) -> (i32, i32) {
    %c0_i32 = arith.constant 0 : i32
    %c0_i32_0 = arith.constant 0 : i32
    %c0_i32_1 = arith.constant 0 : i32
    return %c0_i32, %c0_i32_0 : i32, i32
  }
  func.func @transform_5(%arg0: i32, %arg1: i32) -> (i32, i32) {
    %c0_i32 = arith.constant 0 : i32
    %c0_i32_0 = arith.constant 0 : i32
    %c0_i32_1 = arith.constant 0 : i32
    return %c0_i32, %c0_i32_0 : i32, i32
  }
  func.func @transform_6(%arg0: i32, %arg1: i32) -> (i32, i32) {
    %c0_i32 = arith.constant 0 : i32
    %c0_i32_0 = arith.constant 0 : i32
    return %arg0, %c0_i32 : i32, i32
  }
}

module attributes {stable_mosaic.version = 11 : i64} {
  func.func @_matmul_bias_act_kernel(%arg0: i32, %arg1: i32, %arg2: i32, %arg3: memref<16x128xbf16, #tpu.memory_space<vmem>>, %arg4: memref<128x256xbf16, #tpu.memory_space<vmem>>, %arg5: memref<1x256xf32, #tpu.memory_space<vmem>>, %arg6: memref<16x256xbf16, #tpu.memory_space<vmem>>, %arg7: memref<16x256xf32, #tpu.memory_space<vmem>>) attributes {dimension_semantics = [#tpu.dimension_semantics<parallel>, #tpu.dimension_semantics<parallel>, #tpu.dimension_semantics<arbitrary>], iteration_bounds = array<i64: 1, 1, 1>, scalar_prefetch = 0 : i64, scratch_operands = 1 : i64, tpu.core_type = #tpu.core_type<tc>, window_params = [{transform_indices = @transform_0, window_bounds = array<i64: 16, 128>}, {transform_indices = @transform_1, window_bounds = array<i64: 128, 256>}, {transform_indices = @transform_2, window_bounds = array<i64: 1, 256>}, {transform_indices = @transform_3, window_bounds = array<i64: 16, 256>}]} {
    %c0_i32 = arith.constant 0 : i32
    %0 = arith.cmpi eq, %arg2, %c0_i32 : i32
    %1 = arith.extui %0 : i1 to i32
    %c0_i32_0 = arith.constant 0 : i32
    %2 = arith.cmpi ne, %1, %c0_i32_0 : i32
    scf.if %2 {
      %cst_10 = arith.constant 0.000000e+00 : f32
      %12 = vector.broadcast %cst_10 : f32 to vector<16x256xf32>
      %c0_11 = arith.constant 0 : index
      %c0_12 = arith.constant 0 : index
      %13 = vector.load %arg7[%c0_11, %c0_12] : memref<16x256xf32, #tpu.memory_space<vmem>>, vector<16x256xf32>
      tpu.vector_store %arg7[%c0_11, %c0_12], %12 {strides = array<i32>} : memref<16x256xf32, #tpu.memory_space<vmem>>, vector<16x256xf32>,
    } else {
    }
    %c0 = arith.constant 0 : index
    %c0_1 = arith.constant 0 : index
    %3 = vector.load %arg7[%c0, %c0_1] : memref<16x256xf32, #tpu.memory_space<vmem>>, vector<16x256xf32>
    %c0_2 = arith.constant 0 : index
    %c0_3 = arith.constant 0 : index
    %4 = vector.load %arg3[%c0_2, %c0_3] : memref<16x128xbf16, #tpu.memory_space<vmem>>, vector<16x128xbf16>
    %c0_4 = arith.constant 0 : index
    %c0_5 = arith.constant 0 : index
    %5 = vector.load %arg4[%c0_4, %c0_5] : memref<128x256xbf16, #tpu.memory_space<vmem>>, vector<128x256xbf16>
    %cst = arith.constant dense<0.000000e+00> : vector<16x256xf32>
    %6 = tpu.matmul %4, %5, %cst {dimension_numbers = #tpu.dot_dimension_numbers<[1], [0], [0], [1], [0, 0, 1, 1], [], []>} : vector<16x128xbf16>, vector<128x256xbf16>, vector<16x256xf32> -> vector<16x256xf32>
    %7 = arith.addf %3, %6 : vector<16x256xf32>
    %c0_6 = arith.constant 0 : index
    %c0_7 = arith.constant 0 : index
    %8 = vector.load %arg7[%c0_6, %c0_7] : memref<16x256xf32, #tpu.memory_space<vmem>>, vector<16x256xf32>
    tpu.vector_store %arg7[%c0_6, %c0_7], %7 {strides = array<i32>} : memref<16x256xf32, #tpu.memory_space<vmem>>, vector<16x256xf32>,
    %c0_i32_8 = arith.constant 0 : i32
    %9 = arith.cmpi eq, %arg2, %c0_i32_8 : i32
    %10 = arith.extui %9 : i1 to i32
    %c0_i32_9 = arith.constant 0 : i32
    %11 = arith.cmpi ne, %10, %c0_i32_9 : i32
    scf.if %11 {
      %c0_10 = arith.constant 0 : index
      %c0_11 = arith.constant 0 : index
      %12 = vector.load %arg7[%c0_10, %c0_11] : memref<16x256xf32, #tpu.memory_space<vmem>>, vector<16x256xf32>
      %c0_12 = arith.constant 0 : index
      %c0_13 = arith.constant 0 : index
      %13 = vector.load %arg5[%c0_12, %c0_13] : memref<1x256xf32, #tpu.memory_space<vmem>>, vector<1x256xf32>
      %14 = vector.broadcast %13 : vector<1x256xf32> to vector<16x256xf32>
      %15 = arith.addf %12, %14 : vector<16x256xf32>
      %16 = arith.mulf %15, %15 : vector<16x256xf32>
      %17 = arith.mulf %15, %16 : vector<16x256xf32>
      %cst_14 = arith.constant 4.471500e-02 : f32
      %18 = vector.broadcast %cst_14 : f32 to vector<16x256xf32>
      %19 = arith.mulf %18, %17 : vector<16x256xf32>
      %20 = arith.addf %15, %19 : vector<16x256xf32>
      %cst_15 = arith.constant 0.797884583 : f32
      %21 = vector.broadcast %cst_15 : f32 to vector<16x256xf32>
      %22 = arith.mulf %21, %20 : vector<16x256xf32>
      %23 = math.tanh %22 : vector<16x256xf32>
      %cst_16 = arith.constant 1.000000e+00 : f32
      %24 = vector.broadcast %cst_16 : f32 to vector<16x256xf32>
      %25 = arith.addf %24, %23 : vector<16x256xf32>
      %cst_17 = arith.constant 5.000000e-01 : f32
      %26 = vector.broadcast %cst_17 : f32 to vector<16x256xf32>
      %27 = arith.mulf %26, %25 : vector<16x256xf32>
      %28 = arith.mulf %15, %27 : vector<16x256xf32>
      %29 = arith.truncf %28 : vector<16x256xf32> to vector<16x256xbf16>
      %c0_18 = arith.constant 0 : index
      %c0_19 = arith.constant 0 : index
      %30 = vector.load %arg6[%c0_18, %c0_19] : memref<16x256xbf16, #tpu.memory_space<vmem>>, vector<16x256xbf16>
      tpu.vector_store %arg6[%c0_18, %c0_19], %29 {strides = array<i32>} : memref<16x256xbf16, #tpu.memory_space<vmem>>, vector<16x256xbf16>,
    } else {
    }
    return
  }
  func.func @transform_0(%arg0: i32, %arg1: i32, %arg2: i32) -> (i32, i32) {
    %c0_i32 = arith.constant 0 : i32
    return %arg0, %arg2 : i32, i32
  }
  func.func @transform_1(%arg0: i32, %arg1: i32, %arg2: i32) -> (i32, i32) {
    %c0_i32 = arith.constant 0 : i32
    return %arg2, %arg1 : i32, i32
  }
  func.func @transform_2(%arg0: i32, %arg1: i32, %arg2: i32) -> (i32, i32) {
    %c0_i32 = arith.constant 0 : i32
    %c0_i32_0 = arith.constant 0 : i32
    return %c0_i32, %arg1 : i32, i32
  }
  func.func @transform_3(%arg0: i32, %arg1: i32, %arg2: i32) -> (i32, i32) {
    %c0_i32 = arith.constant 0 : i32
    return %arg0, %arg1 : i32, i32
  }
}

</mosaic_0001>

<bundles_post_ra>
// kernel: forward.11
= control target key start
LH: loop header
LB: loop body
LE: loop exit
PB: predicated region body
PF: predicated region fallthrough
CT: control target
= control target key end

     0   :  { %s124_s0 = inlined_call_operand.vmem [shape: bf16[16,128], index: 0, kind: input, shape index: {}]   ;;  %s125_s1 = inlined_call_operand.vmem [shape: f32[1,128], index: 1, kind: input, shape index: {}]   ;;  %s126_s2 = inlined_call_operand.vmem [shape: f32[1,128], index: 2, kind: input, shape index: {}]   ;;  %s127_s3 = inlined_call_operand.vmem [shape: bf16[16,128], index: 3, kind: output, shape index: {}]  }
   0x1   :  { %v80_v0 = vld [vmem:[%s124_s0] sm:$0xff]  }
   0x2   :  { %v81_v1 = vunpack.c.l.bf16 %v80_v0  ;;  %v82_v2 = vunpack.c.h.bf16 %v80_v0  ;;  %v73_v19 = vld [vmem:[%s125_s1] ss:$0 sm:$0xff] }
   0x3   :  { %v74_v23 = vld [vmem:[%s126_s2] ss:$0 sm:$0xff] }
   0x4   :  { %18 = vadd.xlane.f32.xlu0 %v81_v1 }
   0x8   :  { %20 = vadd.xlane.f32.xlu0 %v82_v2 }
  0x8d   :  { %v19_v3 = vpop.xlane.xlu0 %18 }
  0x8e   :  { %v23_v4 = vmul.f32 0.0078125, %v19_v3 }
  0x90   :  { %v25_v5 = vsub.f32 %v81_v1, %v23_v4 }
  0x91   :  { %v21_v6 = vpop.xlane.xlu0 %20 }
  0x92   :  { %v24_v7 = vmul.f32 0.0078125, %v21_v6  ;;  %v27_v8 = vmul.f32 %v25_v5, %v25_v5 }
  0x94   :  { %v26_v9 = vsub.f32 %v82_v2, %v24_v7  ;;  %29 = vadd.xlane.f32.xlu1 %v27_v8 }
  0x96   :  { %v28_v10 = vmul.f32 %v26_v9, %v26_v9 }
  0x98   :  { %31 = vadd.xlane.f32.xlu1 %v28_v10 }
 0x11d   :  { %v30_v11 = vpop.xlane.xlu1 %29 }
 0x11e   :  { %v33_v12 = vmul.f32 0.0078125, %v30_v11 }
 0x120   :  { %v35_v13 = vadd.f32 1e-12, %v33_v12 }
 0x121   :  { %v32_v14 = vpop.xlane.xlu1 %31 }
 0x122   :  { %88 = vrsqrt.f32 %v35_v13  ;;  %v34_v15 = vmul.f32 0.0078125, %v32_v14 }
 0x124   :  { %v36_v16 = vadd.f32 1e-12, %v34_v15 }
 0x126   :  { %90 = vrsqrt.f32 %v36_v16 }
 0x12f   :  { %v89_v17 = vpop.eup %88 }
 0x130   :  { %v39_v18 = vmul.f32 %v89_v17, %v25_v5 }
 0x132   :  { %v48_v21 = vmul.f32 %v73_v19, %v39_v18 }
 0x133   :  { %v91_v20 = vpop.eup %90 }
 0x134   :  { %v40_v22 = vmul.f32 %v91_v20, %v26_v9  ;;  %v57_v25 = vadd.f32 %v74_v23, %v48_v21 }
 0x136   :  { %v49_v24 = vmul.f32 %v73_v19, %v40_v22 }
 0x138   :  { %v58_v26 = vadd.f32 %v74_v23, %v49_v24 }
 0x13a   :  { %v86_v27 = vpack.c.bf16 %v58_v26, %v57_v25 }
 0x13c   :  { %87 = vst [vmem:[%s127_s3] sm:$0xff] %v86_v27  }

// kernel: forward.12
= control target key start
LH: loop header
LB: loop body
LE: loop exit
PB: predicated region body
PF: predicated region fallthrough
CT: control target
= control target key end

     0   :  { %v453_v0 = vmov 0.0   ;;  %vm454_vm0 = vmmov 0   ;;  %v455_v3 = vmov 0   ;;  %v306_v27 = vlaneseq  ;;  %s566_s1 = inlined_call_operand.vmem [shape: bf16[128,384], index: 1, kind: input, shape index: {}]   ;;  %s567_s0 = inlined_call_operand.vmem [shape: bf16[16,128], index: 0, kind: input, shape index: {}]   ;;  %s568_s2 = inlined_call_operand.vmem [shape: f32[1,384], index: 2, kind: input, shape index: {}]   ;;  %s569_s3 = inlined_call_operand.vmem [shape: bf16[16,384], index: 3, kind: output, shape index: {}]  }
   0x1   :  { %397 = vmatprep.subr.bf16.mxu1 %v453_v0  ;;  %v420_v1 = vld [vmem:[%s566_s1 + $0xac] ss:$12 sps:$4 sm:$0xff]   ;;  %413 = vmatprep.mubr.msk.bf16.mxu1 %vm454_vm0, %v453_v0  ;;  %v422_v2 = vld [vmem:[%s566_s1 + $0xb0] ss:$12 sps:$4 sm:$0xff]   ;;  %v423_v4 = vld [vmem:[%s566_s1 + $0xa8] ss:$12 sps:$4 sm:$0xff]  }
   0x2   :  { %231 = vmatprep.mubr.bf16.mxu0 %v455_v3  ;;  %199 = vmatprep.subr.bf16.mxu0 %v420_v1  ;;  %v424_v5 = vld [vmem:[%s566_s1 + $0x94] ss:$12 sps:$4 sm:$0xff]   ;;  %v426_v6 = vld [vmem:[%s566_s1 + $0x98] ss:$12 sps:$4 sm:$0xff]   ;;  %v427_v7 = vld [vmem:[%s566_s1 + $0x90] ss:$12 sps:$4 sm:$0xff]  }
   0x3   :  { %398 = vmatpush3.bf16.msra.mxu1 %v422_v2  ;;  %200 = vmatpush1.bf16.msra.mxu0 %v423_v4  ;;  %v428_v8 = vld [vmem:[%s566_s1 + $0x7c] ss:$12 sps:$4 sm:$0xff]   ;;  %v430_v9 = vld [vmem:[%s566_s1 + $0x80] ss:$12 sps:$4 sm:$0xff]   ;;  %v431_v10 = vld [vmem:[%s566_s1 + $0x78] ss:$12 sps:$4 sm:$0xff]  }
   0x4   :  { %399 = vmatprep.subr.bf16.mxu1 %v453_v0  ;;  %201 = vmatprep.subr.bf16.mxu0 %v424_v5  ;;  %v432_v11 = vld [vmem:[%s566_s1 + $0x64] ss:$12 sps:$4 sm:$0xff]   ;;  %v434_v12 = vld [vmem:[%s566_s1 + $0x68] ss:$12 sps:$4 sm:$0xff]   ;;  %v435_v13 = vld [vmem:[%s566_s1 + $0x60] ss:$12 sps:$4 sm:$0xff]  }
   0x5   :  { %v436_v14 = vld [vmem:[%s566_s1 + $0x4c] ss:$12 sps:$4 sm:$0xff]   ;;  %v438_v15 = vld [vmem:[%s566_s1 + $0x50] ss:$12 sps:$4 sm:$0xff]   ;;  %v439_v16 = vld [vmem:[%s566_s1 + $0x48] ss:$12 sps:$4 sm:$0xff]  }
   0x6   :  { %v440_v17 = vld [vmem:[%s566_s1 + $0x34] ss:$12 sps:$4 sm:$0xff]   ;;  %v442_v18 = vld [vmem:[%s566_s1 + $0x38] ss:$12 sps:$4 sm:$0xff]   ;;  %v443_v19 = vld [vmem:[%s566_s1 + $0x30] ss:$12 sps:$4 sm:$0xff]  }
   0x7   :  { %400 = vmatpush3.bf16.msra.mxu1 %v426_v6  ;;  %202 = vmatpush1.bf16.msra.mxu0 %v427_v7  ;;  %v444_v20 = vld [vmem:[%s566_s1 + $0x1c] ss:$12 sps:$4 sm:$0xff]   ;;  %v446_v21 = vld [vmem:[%s566_s1 + $0x20] ss:$12 sps:$4 sm:$0xff]   ;;  %v447_v22 = vld [vmem:[%s566_s1 + $0x18] ss:$12 sps:$4 sm:$0xff]  }
   0x8   :  { %401 = vmatprep.subr.bf16.mxu1 %v453_v0  ;;  %203 = vmatprep.subr.bf16.mxu0 %v428_v8  ;;  %v448_v23 = vld [vmem:[%s566_s1 + $0x4] ss:$12 sps:$4 sm:$0xff]   ;;  %v450_v24 = vld [vmem:[%s566_s1 + $0x8] ss:$12 sps:$4 sm:$0xff]   ;;  %v451_v25 = vld [vmem:[%s566_s1] ss:$12 sps:$4 sm:$0xff]  }
   0x9   :  { %v452_v26 = vld [vmem:[%s567_s0] sm:$0xff]   ;;  %v307_v28 = vshrl.u32 %v306_v27, 7 }
   0xa   :  { %v304_v30 = vld [vmem:[%s568_s2] sm:$0x7] }
   0xb   :  { %402 = vmatpush3.bf16.msra.mxu1 %v430_v9  ;;  %204 = vmatpush1.bf16.msra.mxu0 %v431_v10  ;;  %v316_v29 = vsub.s32 2, %v307_v28  ;;  %v308_v31 = vsub.s32 0, %v307_v28  ;;  %v312_v32 = vsub.s32 1, %v307_v28 }
   0xc   :  { %403 = vmatprep.subr.bf16.mxu1 %v453_v0  ;;  %205 = vmatprep.subr.bf16.mxu0 %v432_v11 }
   0xd   :  { %v317_v33 = vrot.slane %v304_v30, %v316_v29  ;;  %v309_v35 = vrot.slane %v304_v30, %v308_v31  ;;  %v313_v36 = vrot.slane %v304_v30, %v312_v32 }
   0xf   :  { %404 = vmatpush3.bf16.msra.mxu1 %v434_v12  ;;  %206 = vmatpush1.bf16.msra.mxu0 %v435_v13 }
  0x10   :  { %405 = vmatprep.subr.bf16.mxu1 %v453_v0  ;;  %207 = vmatprep.subr.bf16.mxu0 %v436_v14 }
  0x13   :  { %406 = vmatpush3.bf16.msra.mxu1 %v438_v15  ;;  %208 = vmatpush1.bf16.msra.mxu0 %v439_v16 }
  0x14   :  { %407 = vmatprep.subr.bf16.mxu1 %v453_v0  ;;  %209 = vmatprep.subr.bf16.mxu0 %v440_v17 }
  0x17   :  { %408 = vmatpush3.bf16.msra.mxu1 %v442_v18  ;;  %210 = vmatpush1.bf16.msra.mxu0 %v443_v19 }
  0x18   :  { %409 = vmatprep.subr.bf16.mxu1 %v453_v0  ;;  %211 = vmatprep.subr.bf16.mxu0 %v444_v20 }
  0x1b   :  { %410 = vmatpush3.bf16.msra.mxu1 %v446_v21  ;;  %212 = vmatpush1.bf16.msra.mxu0 %v447_v22 }
  0x1c   :  { %411 = vmatprep.subr.bf16.mxu1 %v453_v0  ;;  %213 = vmatprep.subr.bf16.mxu0 %v448_v23 }
  0x1f   :  { %412 = vmatpush3.bf16.msra.mxu1 %v450_v24  ;;  %214 = vmatpush1.bf16.msra.mxu0 %v451_v25 }
  0x22   :  { %414 = vmatmul.mubr.bf16.vlgmr.msra.gmra.mxu1 %v452_v26  ;;  %232 = vmatmul.mubr.bf16.vlgmr.msra.gmra.mxu0 %v452_v26 }
  0xe2   :  { %v276_v34 = vpop.f32.mrf.mxu1  ;;  %v233_v38 = vpop.f32.mrf.mxu0 }
  0xe3   :  { %v323_v37 = vadd.f32 %v317_v33, %v276_v34  ;;  %v321_v42 = vadd.f32 %v309_v35, %v233_v38 }
  0xe4   :  { %v415_v39 = vpop.f32.mrf.mxu1  ;;  %v235_v41 = vpop.f32.mrf.mxu0 }
  0xe5   :  { %v385_v40 = vpack.c.bf16 %v323_v37, %v323_v37  ;;  %v322_v43 = vadd.f32 %v313_v36, %v235_v41 }
  0xe6   :  { %v279_v44 = vpop.f32.mrf.mxu1  ;;  %v237_v46 = vpop.f32.mrf.mxu0 }
  0xe7   :  { %348 = vst [vmem:[%s569_s3 + $0x8] sm:$0xf] %v385_v40  ;;  %v326_v45 = vadd.f32 %v317_v33, %v279_v44  ;;  %v384_v47 = vpack.c.bf16 %v322_v43, %v321_v42  ;;  %v324_v51 = vadd.f32 %v309_v35, %v237_v46 }
  0xe8   :  { %v416_v48 = vpop.f32.mrf.mxu1  ;;  %v239_v50 = vpop.f32.mrf.mxu0 }
  0xe9   :  { %v387_v49 = vpack.c.bf16 %v326_v45, %v326_v45  ;;  %347 = vst [vmem:[%s569_s3] sm:$0xff] %v384_v47  ;;  %v325_v52 = vadd.f32 %v313_v36, %v239_v50 }
  0xeb   :  { %350 = vst [vmem:[%s569_s3 + $0x14] sm:$0xf] %v387_v49  ;;  %v386_v53 = vpack.c.bf16 %v325_v52, %v324_v51 }
  0xed   :  { %349 = vst [vmem:[%s569_s3 + $0xc] sm:$0xff] %v386_v53 }

// kernel: forward.14
= control target key start
LH: loop header
LB: loop body
LE: loop exit
PB: predicated region body
PF: predicated region fallthrough
CT: control target
= control target key end

     0   :  { %v293_v0 = vmov 0.0   ;;  %vm294_vm0 = vmmov 0   ;;  %s372_s1 = inlined_call_operand.vmem [shape: bf16[128,128], index: 1, kind: input, shape index: {}]   ;;  %s373_s0 = inlined_call_operand.vmem [shape: bf16[16,128], index: 0, kind: input, shape index: {}]   ;;  %s374_s3 = inlined_call_operand.vmem [shape: bf16[16,128], index: 3, kind: input, shape index: {}]   ;;  %s375_s2 = inlined_call_operand.vmem [shape: f32[1,128], index: 2, kind: input, shape index: {}]   ;;  %s376_s4 = inlined_call_operand.vmem [shape: f32[1,128], index: 4, kind: input, shape index: {}]   ;;  %s377_s5 = inlined_call_operand.vmem [shape: f32[1,128], index: 5, kind: input, shape index: {}]   ;;  %s378_s6 = inlined_call_operand.vmem [shape: bf16[16,128], index: 6, kind: output, shape index: {}]  }
   0x1   :  { %258 = vmatprep.subr.bf16.mxu0 %v293_v0  ;;  %v280_v1 = vld [vmem:[%s372_s1 + $0x38] sm:$0xff]   ;;  %274 = vmatprep.mubr.msk.bf16.mxu0 %vm294_vm0, %v293_v0  ;;  %v281_v2 = vld [vmem:[%s372_s1 + $0x30] sm:$0xff]   ;;  %v282_v3 = vld [vmem:[%s372_s1 + $0x28] sm:$0xff]  }
   0x2   :  { %259 = vmatpush3.bf16.msra.mxu0 %v280_v1  ;;  %v283_v4 = vld [vmem:[%s372_s1 + $0x20] sm:$0xff]   ;;  %v284_v5 = vld [vmem:[%s372_s1 + $0x18] sm:$0xff]   ;;  %v285_v6 = vld [vmem:[%s372_s1 + $0x10] sm:$0xff]  }
   0x3   :  { %260 = vmatprep.subr.bf16.mxu0 %v293_v0  ;;  %v286_v7 = vld [vmem:[%s372_s1 + $0x8] sm:$0xff]   ;;  %v287_v8 = vld [vmem:[%s372_s1] sm:$0xff]  }
   0x4   :  { %v288_v9 = vld [vmem:[%s373_s0] sm:$0xff]  }
   0x5   :  { %v241_v10 = vld [vmem:[%s374_s3] sm:$0xff]  }
   0x6   :  { %261 = vmatpush3.bf16.msra.mxu0 %v281_v2  ;;  %v233_v11 = vld [vmem:[%s375_s2] ss:$0 sm:$0xff]  ;;  %v242_v12 = vunpack.c.l.bf16 %v241_v10  ;;  %v243_v17 = vunpack.c.h.bf16 %v241_v10 }
   0x7   :  { %262 = vmatprep.subr.bf16.mxu0 %v293_v0  ;;  %v234_v38 = vld [vmem:[%s376_s4] ss:$0 sm:$0xff] }
   0x8   :  { %v235_v42 = vld [vmem:[%s377_s5] ss:$0 sm:$0xff] }
   0xa   :  { %263 = vmatpush3.bf16.msra.mxu0 %v282_v3 }
   0xb   :  { %264 = vmatprep.subr.bf16.mxu0 %v293_v0 }
   0xe   :  { %265 = vmatpush3.bf16.msra.mxu0 %v283_v4 }
   0xf   :  { %266 = vmatprep.subr.bf16.mxu0 %v293_v0 }
  0x12   :  { %267 = vmatpush3.bf16.msra.mxu0 %v284_v5 }
  0x13   :  { %268 = vmatprep.subr.bf16.mxu0 %v293_v0 }
  0x16   :  { %269 = vmatpush3.bf16.msra.mxu0 %v285_v6 }
  0x17   :  { %270 = vmatprep.subr.bf16.mxu0 %v293_v0 }
  0x1a   :  { %271 = vmatpush3.bf16.msra.mxu0 %v286_v7 }
  0x1b   :  { %272 = vmatprep.subr.bf16.mxu0 %v293_v0 }
  0x1e   :  { %273 = vmatpush3.bf16.msra.mxu0 %v287_v8 }
  0x21   :  { %275 = vmatmul.mubr.bf16.vlgmr.msra.gmra.mxu0 %v288_v9 }
  0xe1   :  { %v138_v13 = vpop.f32.mrf.mxu0 }
  0xe2   :  { %v161_v14 = vadd.f32 %v233_v11, %v138_v13 }
  0xe3   :  { %v276_v15 = vpop.f32.mrf.mxu0 }
  0xe4   :  { %v167_v16 = vadd.f32 %v242_v12, %v161_v14 }
  0xe5   :  { %v141_v18 = vpop.f32.mrf.mxu0 }
  0xe6   :  { %v162_v19 = vadd.f32 %v233_v11, %v141_v18  ;;  %169 = vadd.xlane.f32.xlu0 %v167_v16 }
  0xe7   :  { %v277_v20 = vpop.f32.mrf.mxu0 }
  0xe8   :  { %v168_v21 = vadd.f32 %v243_v17, %v162_v19 }
  0xea   :  { %171 = vadd.xlane.f32.xlu0 %v168_v21 }
 0x16f   :  { %v170_v22 = vpop.xlane.xlu0 %169 }
 0x170   :  { %v174_v23 = vmul.f32 0.0078125, %v170_v22 }
 0x172   :  { %v176_v24 = vsub.f32 %v167_v16, %v174_v23 }
 0x173   :  { %v172_v25 = vpop.xlane.xlu0 %171 }
 0x174   :  { %v175_v26 = vmul.f32 0.0078125, %v172_v25  ;;  %v178_v27 = vmul.f32 %v176_v24, %v176_v24 }
 0x176   :  { %v177_v28 = vsub.f32 %v168_v21, %v175_v26  ;;  %180 = vadd.xlane.f32.xlu1 %v178_v27 }
 0x178   :  { %v179_v29 = vmul.f32 %v177_v28, %v177_v28 }
 0x17a   :  { %182 = vadd.xlane.f32.xlu1 %v179_v29 }
 0x1ff   :  { %v181_v30 = vpop.xlane.xlu1 %180 }
 0x200   :  { %v184_v31 = vmul.f32 0.0078125, %v181_v30 }
 0x202   :  { %v186_v32 = vadd.f32 1e-12, %v184_v31 }
 0x203   :  { %v183_v33 = vpop.xlane.xlu1 %182 }
 0x204   :  { %289 = vrsqrt.f32 %v186_v32  ;;  %v185_v34 = vmul.f32 0.0078125, %v183_v33 }
 0x206   :  { %v187_v35 = vadd.f32 1e-12, %v185_v34 }
 0x208   :  { %291 = vrsqrt.f32 %v187_v35 }
 0x211   :  { %v290_v36 = vpop.eup %289 }
 0x212   :  { %v190_v37 = vmul.f32 %v290_v36, %v176_v24 }
 0x214   :  { %v199_v40 = vmul.f32 %v234_v38, %v190_v37 }
 0x215   :  { %v292_v39 = vpop.eup %291 }
 0x216   :  { %v191_v41 = vmul.f32 %v292_v39, %v177_v28  ;;  %v208_v44 = vadd.f32 %v235_v42, %v199_v40 }
 0x218   :  { %v200_v43 = vmul.f32 %v234_v38, %v191_v41 }
 0x21a   :  { %v209_v45 = vadd.f32 %v235_v42, %v200_v43 }
 0x21c   :  { %v247_v46 = vpack.c.bf16 %v209_v45, %v208_v44 }
 0x21e   :  { %248 = vst [vmem:[%s378_s6] sm:$0xff] %v247_v46  }

// kernel: forward.13
= control target key start
LH: loop header
LB: loop body
LE: loop exit
PB: predicated region body
PF: predicated region fallthrough
CT: control target
= control target key end

     0   :  { %s965_s15 = smov 0   ;;  %s967_s16 = smov 0   ;;  %s1062_s0 = inlined_call_operand.vmem [shape: bf16[2,8,384], index: 0, kind: input, shape index: {}, may-alias: {0,1,2}]   ;;  %s1063_s1 = inlined_call_operand.vmem [shape: bf16[2,8,384], index: 1, kind: input, shape index: {}, may-alias: {0,1,2}]   ;;  %s1064_s2 = inlined_call_operand.vmem [shape: bf16[2,8,384], index: 2, kind: input, shape index: {}, may-alias: {0,1,2}]   ;;  %s1065_s3 = inlined_call_operand.vmem [shape: f32[2,1,8], index: 3, kind: input, shape index: {}]   ;;  %s1066_s4 = inlined_call_operand.vmem [shape: bf16[2,8,128], index: 4, kind: output, shape index: {}]  }
   0x1   :  { %s969_s17 = smov 0  }
   0x2 LB: > { %s33_s18 = sadd.s32 1, %s929_s16  ;;  %p814_p0 = scmp.ge.s32.totalorder %s933_s17, 1  ;;  %s933_s17 = sphi %s969_s17, %s14_s17   ;;  %s929_s16 = sphi %s967_s16, %s1068_s16   ;;  %s925_s15 = sphi %s965_s15, %s1067_s15  }
   0x3   : > { %p35_p1 = scmp.ge.s32.totalorder %s33_s18, 2  ;;  %p236_p2 = scmp.lt.s32.totalorder %s933_s17, 3 }
   0x5   : > { %s1070_s18 = smov (%p35_p1, %s33_s18), 0  ;;  %p237_p3 = pnand %p814_p0, %p236_p2 }
   0x6   : > { %p294_p4 = scmp.lt.s32.totalorder (!%p237_p3), %s925_s15, 1  ;;  %s939_s29 = smov (!%p237_p3), 64  }
   0x7   : > { %240 = sbr.rel (%p237_p3) target bundleno = 1399 (0x577), region = 36 }
   0xc   : > { %vm347_vm0 = vcmask 523264   ;;  %v935_v0 = vmov 0.0   ;;  %vm936_vm1 = vmmov 0   ;;  %s1072_s15 = smov (!%p294_p4, %s925_s15), 1  ;;  %vm342_vm2 = vcmask 7168  }
   0xd   : > { %841 = vmatprep.subr.bf16.mxu0 %v935_v0  ;;  %348 = vst.msk [vmem:[#allocation4] sm:$0xff] %vm347_vm0, %v935_v0  ;;  %349 = vst.msk [vmem:[#allocation4 + $0x8] sm:$0xff] %vm347_vm0, %v935_v0  ;;  %843 = vmatprep.mubr.msk.bf16.mxu0 %vm936_vm1, %v935_v0  ;;  %s996_s19 = smul.u32 12, %s1072_s15  ;;  %v937_v5 = vmov -inf   ;;  %s328_s28 = scalar_lea.vmem %s1065_s3, %s1072_s15  ;;  %vm409_vm3 = vcmask 64512   ;;  %v938_v13 = vmov 0  }
   0xe   : > { %847 = vmatprep.subr.bf16.mxu1 %v935_v0  ;;  %849 = vmatprep.mubr.msk.bf16.mxu1 %vm936_vm1, %v935_v0  ;;  %343 = vst.msk [vmem:[#allocation2] sm:$0xff] %vm342_vm2, %v937_v5  ;;  %344 = vst.msk [vmem:[#allocation2 + $0x8] sm:$0xff] %vm342_vm2, %v937_v5  ;;  %v821_v6 = vld [vmem:[%s328_s28] ss:$0 sm:$0xff]  ;;  %vm444_vm4 = vcmask 1043456   ;;  %s818_s7 = sshll.u32 %s1072_s15, 2 }
   0xf   : > { %s742_s22 = scalar_lea.vmem %s1063_s1, %s996_s19  ;;  %s302_s25 = scalar_lea.vmem %s1062_s0, %s996_s19  ;;  %345 = vst.msk [vmem:[#allocation3] sm:$0xff] %vm342_vm2, %v935_v0  ;;  %346 = vst.msk [vmem:[#allocation3 + $0x8] sm:$0xff] %vm342_vm2, %v935_v0  ;;  %895 = vset.pattern.permute.xlu0 %v938_v13  ;;  %896 = vset.pattern.permute.xlu1 %v938_v13 }
  0x10   : > { %v819_v1 = vld [vmem:[%s742_s22 + $0x4] sm:$0xf]  ;;  %v351_v3 = vld [vmem:[%s302_s25] sm:$0xf]  ;;  %s748_s6 = scalar_lea.vmem %s1064_s2, %s996_s19  ;;  %s335_s10 = scalar_lea.vmem %s1066_s4, %s818_s7 }
  0x11   : > { %v366_v2 = vsel %vm347_vm0, %v819_v1, 0  ;;  %v352_v4 = vmul.bf16 1040203264, %v351_v3  ;;  %v897_v14 = vld [vmem:[%s742_s22 + $0x4] ss:$0 sps:$4 sm:$0xff]  }
  0x12   : > { %842 = vmatpush3.bf16.xpose.msra.mxu0 %v366_v2  ;;  %v491_v15 = vld [vmem:[%s302_s25] sm:$0xf]  ;;  %503 = vrot.lane.b32.xlu1 %v897_v14, %s939_s29  ;;  %v820_v22 = vld [vmem:[%s748_s6 + $0x8] sm:$0xf] }
  0x13   : > { %859 = vmatprep.subr.bf16.mxu0 %v935_v0  ;;  %v492_v16 = vmul.bf16 1040203264, %v491_v15  ;;  %v898_v23 = vld [vmem:[%s748_s6 + $0x8] ss:$0 sps:$4 sm:$0xff]   ;;  %v446_v24 = vsel %vm444_vm4, %v820_v22, 0 }
  0x14   : > { %848 = vmatpush3.bf16.msra.mxu1 %v446_v24  ;;  %v577_v13 = vld [vmem:[#allocation4 + $0x8] sm:$0xff] }
  0x15   : > { %v826_v17 = vcombine.low %v492_v16, %v492_v16  ;;  %v408_v18 = vld [vmem:[#allocation2] sm:$0xff]  ;;  %853 = vmatprep.subr.bf16.mxu1 %v935_v0  ;;  %v552_v43 = vld [vmem:[#allocation2 + $0x8] sm:$0xff] }
  0x16   : > { %v425_v60 = vld [vmem:[#allocation3] sm:$0xff]  ;;  %v569_v2 = vld [vmem:[#allocation3 + $0x8] sm:$0xff] }
  0x17   : > { %498 = vrot.lane.b32.xlu1 %v826_v17, %s939_s29 }
  0x19   : > { %844 = vmatmul.mubr.msk.bf16.vlgmr.msra.gmra.mxu0 %vm347_vm0, %v352_v4 }
  0x1a   : > { %861 = vmatprep.mubr.msk.bf16.mxu0 %vm936_vm1, %v935_v0 }
  0x84   : > { %v504_v28 = vpop.permute.xlu1 %503 }
  0x85   : > { %v509_v30 = vsel %vm347_vm0, %v504_v28, 0 }
  0x89   : > { %v499_v32 = vpop.permute.xlu1 %498 }
  0xd9   : > { %v402_v7 = vpop.f32.mrf.mxu0 }
  0xda   : > { %v403_v8 = vadd.f32 %v821_v6, %v402_v7  ;;  %v433_v7 = vld [vmem:[#allocation4] sm:$0xff] }
  0xdb   : > { %v845_v9 = vpop.f32.mrf.mxu0 }
  0xdc   : > { %v410_v10 = vsel %vm409_vm3, %v403_v8, -inf }
  0xdd   : > { %411 = vmax.xlane.f32.xlu0 %v410_v10  ;;  %v405_v11 = vpop.f32.mrf.mxu0 }
  0xdf   : > { %v846_v12 = vpop.f32.mrf.mxu0 }
 0x166   : > { %v412_v19 = vpop.xlane.xlu0 %411 }
 0x167   : > { %v413_v20 = vmax.f32 %v408_v18, %v412_v19 }
 0x169   : > { %v414_v21 = vsub.f32 %v408_v18, %v413_v20  ;;  %490 = vst.msk [vmem:[#allocation2] sm:$0xff] %vm342_vm2, %v413_v20  ;;  %419 = vperm.xlu0 %895, %v413_v20  }
 0x16b   : > { %v415_v57 = vmul.f32 1.442695, %v414_v21 }
 0x16d   : > { %588 = vrot.lane.b32.xlu0 %v898_v23, %s939_s29 }
 0x1e4   : > { %v420_v25 = vpop.permute.xlu0 %419 }
 0x1e5   : > { %v422_v26 = vsub.f32 %v403_v8, %v420_v25 }
 0x1e7   : > { %v423_v27 = vmul.f32 1.442695, %v422_v26 }
 0x1e8   : > { %v589_v47 = vpop.permute.xlu0 %588 }
 0x1e9   : > { %899 = vpow2.f32 %v423_v27  ;;  %v594_v48 = vsel %vm444_vm4, %v589_v47, 0 }
 0x1ea   : > { %860 = vmatpush3.bf16.msra.mxu0 %v594_v48 }
 0x1f6   : > { %v900_v29 = vpop.eup %899 }
 0x1f7   : > { %v440_v31 = vpack.c.bf16 %v900_v29, %v900_v29  ;;  %v427_v49 = vsel %vm409_vm3, %v900_v29, 0.0 }
 0x1f9   : > { %850 = vmatmul.mubr.msk.bf16.vlgmr.msra.gmra.mxu1 %vm409_vm3, %v440_v31 }
 0x1fa   : > { %854 = vmatpush3.bf16.xpose.msra.mxu1 %v509_v30  ;;  %855 = vmatprep.mubr.msk.bf16.mxu1 %vm936_vm1, %v935_v0 }
 0x201   : > { %856 = vmatmul.mubr.msk.bf16.vlgmr.msra.gmra.mxu1 %vm347_vm0, %v499_v32 }
 0x2b9   : > { %v482_v33 = vpop.f32.mrf.mxu1 }
 0x2bb   : > { %v851_v34 = vpop.f32.mrf.mxu1 }
 0x2bd   : > { %v485_v35 = vpop.f32.mrf.mxu1 }
 0x2bf   : > { %v852_v36 = vpop.f32.mrf.mxu1 }
 0x2c1   : > { %v545_v37 = vpop.f32.mrf.mxu1 }
 0x2c2   : > { %v546_v38 = vadd.f32 %v821_v6, %v545_v37 }
 0x2c3   : > { %v857_v39 = vpop.f32.mrf.mxu1 }
 0x2c4   : > { %v553_v40 = vsel %vm409_vm3, %v546_v38, -inf }
 0x2c5   : > { %554 = vmax.xlane.f32.xlu1 %v553_v40  ;;  %v548_v41 = vpop.f32.mrf.mxu1 }
 0x2c7   : > { %v858_v42 = vpop.f32.mrf.mxu1 }
 0x34e   : > { %v555_v44 = vpop.xlane.xlu1 %554 }
 0x34f   : > { %v556_v45 = vmax.f32 %v552_v43, %v555_v44 }
 0x351   : > { %v557_v46 = vsub.f32 %v552_v43, %v556_v45  ;;  %638 = vst.msk [vmem:[#allocation2 + $0x8] sm:$0xff] %vm342_vm2, %v556_v45  ;;  %562 = vperm.xlu1 %896, %v556_v45  }
 0x353   : > { %v558_v56 = vmul.f32 1.442695, %v557_v46 }
 0x375   : > { %428 = vadd.xlane.f32.xlu1 %v427_v49 }
 0x3cc   : > { %v563_v50 = vpop.permute.xlu1 %562 }
 0x3cd   : > { %v565_v51 = vsub.f32 %v546_v38, %v563_v50 }
 0x3cf   : > { %v566_v52 = vmul.f32 1.442695, %v565_v51 }
 0x3d1   : > { %901 = vpow2.f32 %v566_v52 }
 0x3d2   : > { %903 = vpow2.f32 %v558_v56 }
 0x3d3   : > { %905 = vpow2.f32 %v415_v57 }
 0x3de   : > { %v902_v53 = vpop.eup %901 }
 0x3df   : > { %v571_v54 = vsel %vm409_vm3, %v902_v53, 0.0  ;;  %v584_v55 = vpack.c.bf16 %v902_v53, %v902_v53  ;;  %v904_v58 = vpop.eup %903 }
 0x3e0   : > { %572 = vadd.xlane.f32.xlu0 %v571_v54  ;;  %v906_v59 = vpop.eup %905  ;;  %v570_v3 = vmul.f32 %v904_v58, %v569_v2 }
 0x3e1   : > { %862 = vmatmul.mubr.msk.bf16.vlgmr.msra.gmra.mxu0 %vm409_vm3, %v584_v55  ;;  %v426_v61 = vmul.f32 %v906_v59, %v425_v60 }
 0x3f6   : > { %580 = vperm.xlu0 %895, %v904_v58  }
 0x3fa   : > { %436 = vperm.xlu0 %895, %v906_v59  }
 0x3fe   : > { %v429_v62 = vpop.xlane.xlu1 %428 }
 0x3ff   : > { %v430_v63 = vadd.f32 %v429_v62, %v426_v61 }
 0x401   : > { %432 = vst.msk [vmem:[#allocation3] sm:$0xff] %vm342_vm2, %v430_v63 }
 0x408   : > { %v642_v0 = vld [vmem:[#allocation3] sm:$0xff] }
 0x409   : > { %907 = vrcp.f32 %v642_v0 }
 0x416   : > { %v908_v1 = vpop.eup %907 }
 0x417   : > { %647 = vperm.xlu0 %895, %v908_v1  }
 0x469   : > { %v573_v4 = vpop.xlane.xlu0 %572 }
 0x46a   : > { %v574_v5 = vadd.f32 %v573_v4, %v570_v3 }
 0x46c   : > { %575 = vst.msk [vmem:[#allocation3 + $0x8] sm:$0xff] %vm342_vm2, %v574_v5 }
 0x471   : > { %v581_v6 = vpop.permute.xlu0 %580 }
 0x472   : > { %v583_v14 = vmul.f32 %v581_v6, %v577_v13 }
 0x473   : > { %v651_v8 = vld [vmem:[#allocation3 + $0x8] sm:$0xff] }
 0x474   : > { %909 = vrcp.f32 %v651_v8 }
 0x475   : > { %v437_v9 = vpop.permute.xlu0 %436 }
 0x476   : > { %v439_v10 = vmul.f32 %v437_v9, %v433_v7 }
 0x478   : > { %v488_v11 = vadd.f32 %v482_v33, %v439_v10 }
 0x47a   : > { %489 = vst.msk [vmem:[#allocation4] sm:$0xff] %vm347_vm0, %v488_v11 }
 0x481   : > { %v910_v12 = vpop.eup %909  ;;  %v644_v24 = vld [vmem:[#allocation4] sm:$0xff] }
 0x482   : > { %656 = vperm.xlu1 %896, %v910_v12  }
 0x492   : > { %v648_v23 = vpop.permute.xlu0 %647 }
 0x493   : > { %v650_v25 = vmul.f32 %v648_v23, %v644_v24 }
 0x4a1   : > { %v630_v15 = vpop.f32.mrf.mxu0 }
 0x4a2   : > { %v636_v16 = vadd.f32 %v630_v15, %v583_v14 }
 0x4a3   : > { %v863_v17 = vpop.f32.mrf.mxu0 }
 0x4a4   : > { %637 = vst.msk [vmem:[#allocation4 + $0x8] sm:$0xff] %vm347_vm0, %v636_v16 }
 0x4a5   : > { %v633_v18 = vpop.f32.mrf.mxu0 }
 0x4a7   : > { %v864_v19 = vpop.f32.mrf.mxu0 }
 0x4ab   : > { %v653_v21 = vld [vmem:[#allocation4 + $0x8] sm:$0xff] }
 0x4fd   : > { %v657_v20 = vpop.permute.xlu1 %656 }
 0x4fe   : > { %v659_v22 = vmul.f32 %v657_v20, %v653_v21 }
 0x500   : > { %661 = vrot.lane.b32.xlu0 %v659_v22, %s939_s29 }
 0x572   : > { %v662_v26 = vpop.permute.xlu0 %661 }
 0x573   : > { %v664_v27 = vsel %vm347_vm0, %v650_v25, %v662_v26 }
 0x574   : > { %v665_v28 = vpack.c.bf16 %v664_v27, %v664_v27 }
 0x576   : > { %666 = vst [vmem:[%s335_s10] sm:$0xf] %v665_v28 }
 0x577 PF: > { %s14_s17 = sadd.s32 1, %s933_s17   ;;  %s1067_s15 = smov %s929_s16 }
 0x578   : > { %p11_p5 = scmp.ge.s32.totalorder %s14_s17, 4   ;;  %s1068_s16 = smov %s1070_s18 }
 0x57a   :  { %13 = sbr.rel (!%p11_p5) target bundleno = 2 (0x2), region = 86 }

// kernel: forward.16
= control target key start
LH: loop header
LB: loop body
LE: loop exit
PB: predicated region body
PF: predicated region fallthrough
CT: control target
= control target key end

     0   :  { %s475_s1 = inlined_call_operand.vmem [shape: bf16[256,128], index: 1, kind: input, shape index: {}]   ;;  %s476_s0 = inlined_call_operand.vmem [shape: bf16[16,256], index: 0, kind: input, shape index: {}]   ;;  %s477_s3 = inlined_call_operand.vmem [shape: bf16[16,128], index: 3, kind: input, shape index: {}]   ;;  %s478_s2 = inlined_call_operand.vmem [shape: f32[1,128], index: 2, kind: input, shape index: {}]   ;;  %s479_s4 = inlined_call_operand.vmem [shape: f32[1,128], index: 4, kind: input, shape index: {}]   ;;  %s480_s5 = inlined_call_operand.vmem [shape: f32[1,128], index: 5, kind: input, shape index: {}]   ;;  %s481_s6 = inlined_call_operand.vmem [shape: bf16[16,128], index: 6, kind: output, shape index: {}]  }
   0x1   :  { %v348_v0 = vld [vmem:[%s475_s1 + $0x78] sm:$0xff]   ;;  %v350_v2 = vld [vmem:[%s475_s1 + $0x70] sm:$0xff]   ;;  %v352_v4 = vld [vmem:[%s475_s1 + $0x68] sm:$0xff]  }
   0x2   :  { %v349_v1 = vld [vmem:[%s475_s1 + $0x38] sm:$0xff]   ;;  %326 = vmatprep.subr.bf16.mxu0 %v348_v0  ;;  %v351_v3 = vld [vmem:[%s475_s1 + $0x30] sm:$0xff]   ;;  %v353_v5 = vld [vmem:[%s475_s1 + $0x28] sm:$0xff]  }
   0x3   :  { %327 = vmatpush3.bf16.msra.mxu0 %v349_v1  ;;  %v354_v6 = vld [vmem:[%s475_s1 + $0x60] sm:$0xff]   ;;  %v356_v8 = vld [vmem:[%s475_s1 + $0x58] sm:$0xff]   ;;  %v358_v10 = vld [vmem:[%s475_s1 + $0x50] sm:$0xff]  }
   0x4   :  { %328 = vmatprep.subr.bf16.mxu0 %v350_v2  ;;  %v355_v7 = vld [vmem:[%s475_s1 + $0x20] sm:$0xff]   ;;  %v357_v9 = vld [vmem:[%s475_s1 + $0x18] sm:$0xff]   ;;  %v359_v12 = vld [vmem:[%s475_s1 + $0x10] sm:$0xff]  }
   0x5   :  { %v366_v11 = vld [vmem:[%s476_s0 + $0x4] ss:$8 sps:$4 sm:$0xff]   ;;  %v364_v17 = vld [vmem:[%s476_s0] ss:$8 sps:$4 sm:$0xff]  }
   0x6   :  { %204 = vmatprep.mubr.bf16.mxu0 %v366_v11  ;;  %v360_v13 = vld [vmem:[%s475_s1 + $0x48] sm:$0xff]   ;;  %v362_v15 = vld [vmem:[%s475_s1 + $0x40] sm:$0xff]  }
   0x7   :  { %329 = vmatpush3.bf16.msra.mxu0 %v351_v3  ;;  %v361_v14 = vld [vmem:[%s475_s1 + $0x8] sm:$0xff]   ;;  %v363_v16 = vld [vmem:[%s475_s1] sm:$0xff]  }
   0x8   :  { %330 = vmatprep.subr.bf16.mxu0 %v352_v4  ;;  %v318_v19 = vld [vmem:[%s477_s3] sm:$0xff]  }
   0x9   :  { %v310_v21 = vld [vmem:[%s478_s2] ss:$0 sm:$0xff]  ;;  %v319_v23 = vunpack.c.l.bf16 %v318_v19  ;;  %v320_v29 = vunpack.c.h.bf16 %v318_v19 }
   0xa   :  { %v311_v48 = vld [vmem:[%s479_s4] ss:$0 sm:$0xff] }
   0xb   :  { %331 = vmatpush3.bf16.msra.mxu0 %v353_v5  ;;  %v312_v52 = vld [vmem:[%s480_s5] ss:$0 sm:$0xff] }
   0xc   :  { %332 = vmatprep.subr.bf16.mxu0 %v354_v6 }
   0xf   :  { %333 = vmatpush3.bf16.msra.mxu0 %v355_v7 }
  0x10   :  { %334 = vmatprep.subr.bf16.mxu0 %v356_v8 }
  0x13   :  { %335 = vmatpush3.bf16.msra.mxu0 %v357_v9 }
  0x14   :  { %336 = vmatprep.subr.bf16.mxu0 %v358_v10 }
  0x17   :  { %337 = vmatpush3.bf16.msra.mxu0 %v359_v12 }
  0x18   :  { %338 = vmatprep.subr.bf16.mxu0 %v360_v13 }
  0x1b   :  { %339 = vmatpush3.bf16.msra.mxu0 %v361_v14 }
  0x1c   :  { %340 = vmatprep.subr.bf16.mxu0 %v362_v15 }
  0x1f   :  { %341 = vmatpush3.bf16.msra.mxu0 %v363_v16 }
  0x22   :  { %205 = vmatmul.mubr.bf16.vlgmr.msra.gmra.mxu0 %v364_v17 }
  0xe2   :  { %v342_v18 = vpop.f32.mrf.mxu0 }
  0xe4   :  { %v343_v20 = vpop.f32.mrf.mxu0 }
  0xe5   :  { %v344_v22 = vadd.f32 %v343_v20, %v342_v18 }
  0xe6   :  { %v345_v24 = vpop.f32.mrf.mxu0 }
  0xe7   :  { %v229_v25 = vadd.f32 %v344_v22, %v310_v21 }
  0xe8   :  { %v346_v26 = vpop.f32.mrf.mxu0 }
  0xe9   :  { %v347_v27 = vadd.f32 %v346_v26, %v345_v24  ;;  %v235_v28 = vadd.f32 %v319_v23, %v229_v25 }
  0xeb   :  { %v230_v30 = vadd.f32 %v347_v27, %v310_v21  ;;  %237 = vadd.xlane.f32.xlu0 %v235_v28 }
  0xed   :  { %v236_v31 = vadd.f32 %v320_v29, %v230_v30 }
  0xef   :  { %239 = vadd.xlane.f32.xlu0 %v236_v31 }
 0x174   :  { %v238_v32 = vpop.xlane.xlu0 %237 }
 0x175   :  { %v242_v33 = vmul.f32 0.0078125, %v238_v32 }
 0x177   :  { %v244_v34 = vsub.f32 %v235_v28, %v242_v33 }
 0x178   :  { %v240_v35 = vpop.xlane.xlu0 %239 }
 0x179   :  { %v243_v36 = vmul.f32 0.0078125, %v240_v35  ;;  %v246_v37 = vmul.f32 %v244_v34, %v244_v34 }
 0x17b   :  { %v245_v38 = vsub.f32 %v236_v31, %v243_v36  ;;  %248 = vadd.xlane.f32.xlu1 %v246_v37 }
 0x17d   :  { %v247_v39 = vmul.f32 %v245_v38, %v245_v38 }
 0x17f   :  { %250 = vadd.xlane.f32.xlu1 %v247_v39 }
 0x204   :  { %v249_v40 = vpop.xlane.xlu1 %248 }
 0x205   :  { %v252_v41 = vmul.f32 0.0078125, %v249_v40 }
 0x207   :  { %v254_v42 = vadd.f32 1e-12, %v252_v41 }
 0x208   :  { %v251_v43 = vpop.xlane.xlu1 %250 }
 0x209   :  { %367 = vrsqrt.f32 %v254_v42  ;;  %v253_v44 = vmul.f32 0.0078125, %v251_v43 }
 0x20b   :  { %v255_v45 = vadd.f32 1e-12, %v253_v44 }
 0x20d   :  { %369 = vrsqrt.f32 %v255_v45 }
 0x216   :  { %v368_v46 = vpop.eup %367 }
 0x217   :  { %v258_v47 = vmul.f32 %v368_v46, %v244_v34 }
 0x219   :  { %v267_v50 = vmul.f32 %v311_v48, %v258_v47 }
 0x21a   :  { %v370_v49 = vpop.eup %369 }
 0x21b   :  { %v259_v51 = vmul.f32 %v370_v49, %v245_v38  ;;  %v276_v54 = vadd.f32 %v312_v52, %v267_v50 }
 0x21d   :  { %v268_v53 = vmul.f32 %v311_v48, %v259_v51 }
 0x21f   :  { %v277_v55 = vadd.f32 %v312_v52, %v268_v53 }
 0x221   :  { %v324_v56 = vpack.c.bf16 %v277_v55, %v276_v54 }
 0x223   :  { %325 = vst [vmem:[%s481_s6] sm:$0xff] %v324_v56  }

// kernel: forward.15
= control target key start
LH: loop header
LB: loop body
LE: loop exit
PB: predicated region body
PF: predicated region fallthrough
CT: control target
= control target key end

     0   :  { %v314_v1 = vmov 0   ;;  %v191_v18 = vlaneseq  ;;  %s395_s1 = inlined_call_operand.vmem [shape: bf16[128,256], index: 1, kind: input, shape index: {}]   ;;  %s396_s0 = inlined_call_operand.vmem [shape: bf16[16,128], index: 0, kind: input, shape index: {}]   ;;  %s397_s2 = inlined_call_operand.vmem [shape: f32[1,256], index: 2, kind: input, shape index: {}]   ;;  %s398_s3 = inlined_call_operand.vmem [shape: bf16[16,256], index: 3, kind: output, shape index: {}]  }
   0x1   :  { %v281_v0 = vld [vmem:[%s395_s1 + $0x74] ss:$8 sps:$4 sm:$0xff]   ;;  %163 = vmatprep.mubr.bf16.mxu0 %v314_v1  ;;  %v283_v2 = vld [vmem:[%s395_s1 + $0x70] ss:$8 sps:$4 sm:$0xff]   ;;  %v284_v3 = vld [vmem:[%s395_s1 + $0x64] ss:$8 sps:$4 sm:$0xff]  }
   0x2   :  { %131 = vmatprep.subr.bf16.mxu0 %v281_v0  ;;  %v286_v4 = vld [vmem:[%s395_s1 + $0x60] ss:$8 sps:$4 sm:$0xff]   ;;  %v287_v5 = vld [vmem:[%s395_s1 + $0x54] ss:$8 sps:$4 sm:$0xff]   ;;  %v289_v6 = vld [vmem:[%s395_s1 + $0x50] ss:$8 sps:$4 sm:$0xff]  }
   0x3   :  { %132 = vmatpush1.bf16.msra.mxu0 %v283_v2  ;;  %v290_v7 = vld [vmem:[%s395_s1 + $0x44] ss:$8 sps:$4 sm:$0xff]   ;;  %v292_v8 = vld [vmem:[%s395_s1 + $0x40] ss:$8 sps:$4 sm:$0xff]   ;;  %v293_v9 = vld [vmem:[%s395_s1 + $0x34] ss:$8 sps:$4 sm:$0xff]  }
   0x4   :  { %133 = vmatprep.subr.bf16.mxu0 %v284_v3  ;;  %v295_v10 = vld [vmem:[%s395_s1 + $0x30] ss:$8 sps:$4 sm:$0xff]   ;;  %v296_v11 = vld [vmem:[%s395_s1 + $0x24] ss:$8 sps:$4 sm:$0xff]   ;;  %v298_v12 = vld [vmem:[%s395_s1 + $0x20] ss:$8 sps:$4 sm:$0xff]  }
   0x5   :  { %v299_v13 = vld [vmem:[%s395_s1 + $0x14] ss:$8 sps:$4 sm:$0xff]   ;;  %v301_v14 = vld [vmem:[%s395_s1 + $0x10] ss:$8 sps:$4 sm:$0xff]   ;;  %v302_v15 = vld [vmem:[%s395_s1 + $0x4] ss:$8 sps:$4 sm:$0xff]  }
   0x6   :  { %v304_v16 = vld [vmem:[%s395_s1] ss:$8 sps:$4 sm:$0xff]   ;;  %v192_v19 = vshrl.u32 %v191_v18, 7 }
   0x7   :  { %134 = vmatpush1.bf16.msra.mxu0 %v286_v4  ;;  %v305_v17 = vld [vmem:[%s396_s0] sm:$0xff]  }
   0x8   :  { %135 = vmatprep.subr.bf16.mxu0 %v287_v5  ;;  %v193_v20 = vsub.s32 0, %v192_v19  ;;  %v189_v21 = vld [vmem:[%s397_s2] sm:$0x3]  ;;  %v197_v22 = vsub.s32 1, %v192_v19 }
   0xa   :  { %v194_v23 = vrot.slane %v189_v21, %v193_v20  ;;  %v198_v24 = vrot.slane %v189_v21, %v197_v22 }
   0xb   :  { %136 = vmatpush1.bf16.msra.mxu0 %v289_v6 }
   0xc   :  { %137 = vmatprep.subr.bf16.mxu0 %v290_v7 }
   0xf   :  { %138 = vmatpush1.bf16.msra.mxu0 %v292_v8 }
  0x10   :  { %139 = vmatprep.subr.bf16.mxu0 %v293_v9 }
  0x13   :  { %140 = vmatpush1.bf16.msra.mxu0 %v295_v10 }
  0x14   :  { %141 = vmatprep.subr.bf16.mxu0 %v296_v11 }
  0x17   :  { %142 = vmatpush1.bf16.msra.mxu0 %v298_v12 }
  0x18   :  { %143 = vmatprep.subr.bf16.mxu0 %v299_v13 }
  0x1b   :  { %144 = vmatpush1.bf16.msra.mxu0 %v301_v14 }
  0x1c   :  { %145 = vmatprep.subr.bf16.mxu0 %v302_v15 }
  0x1f   :  { %146 = vmatpush1.bf16.msra.mxu0 %v304_v16 }
  0x22   :  { %164 = vmatmul.mubr.bf16.vlgmr.msra.gmra.mxu0 %v305_v17 }
  0xe2   :  { %v165_v25 = vpop.f32.mrf.mxu0 }
  0xe3   :  { %v201_v26 = vadd.f32 %v194_v23, %v165_v25 }
  0xe4   :  { %v167_v27 = vpop.f32.mrf.mxu0 }
  0xe5   :  { %v205_v28 = vmul.f32 %v201_v26, %v201_v26  ;;  %v202_v29 = vadd.f32 %v198_v24, %v167_v27 }
  0xe6   :  { %v169_v30 = vpop.f32.mrf.mxu0 }
  0xe7   :  { %v209_v31 = vmul.f32 %v205_v28, %v201_v26  ;;  %v206_v32 = vmul.f32 %v202_v29, %v202_v29  ;;  %v203_v33 = vadd.f32 %v194_v23, %v169_v30 }
  0xe8   :  { %v171_v34 = vpop.f32.mrf.mxu0 }
  0xe9   :  { %v213_v35 = vmul.f32 0.044715, %v209_v31  ;;  %v210_v36 = vmul.f32 %v206_v32, %v202_v29  ;;  %v207_v37 = vmul.f32 %v203_v33, %v203_v33  ;;  %v204_v38 = vadd.f32 %v198_v24, %v171_v34 }
  0xeb   :  { %v217_v39 = vadd.f32 %v213_v35, %v201_v26  ;;  %v214_v40 = vmul.f32 0.044715, %v210_v36  ;;  %v211_v41 = vmul.f32 %v207_v37, %v203_v33  ;;  %v208_v42 = vmul.f32 %v204_v38, %v204_v38 }
  0xed   :  { %v221_v43 = vmul.f32 0.7978846, %v217_v39  ;;  %v218_v44 = vadd.f32 %v214_v40, %v202_v29  ;;  %v215_v45 = vmul.f32 0.044715, %v211_v41  ;;  %v212_v46 = vmul.f32 %v208_v42, %v204_v38 }
  0xef   :  { %306 = vtanh.f32 %v221_v43  ;;  %v222_v47 = vmul.f32 0.7978846, %v218_v44  ;;  %v219_v48 = vadd.f32 %v215_v45, %v203_v33  ;;  %v216_v49 = vmul.f32 0.044715, %v212_v46 }
  0xf1   :  { %308 = vtanh.f32 %v222_v47  ;;  %v223_v50 = vmul.f32 0.7978846, %v219_v48  ;;  %v220_v51 = vadd.f32 %v216_v49, %v204_v38 }
  0xf3   :  { %310 = vtanh.f32 %v223_v50  ;;  %v224_v52 = vmul.f32 0.7978846, %v220_v51 }
  0xf5   :  { %312 = vtanh.f32 %v224_v52 }
  0xfc   :  { %v307_v53 = vpop.eup %306 }
  0xfd   :  { %v229_v54 = vadd.f32 1.0, %v307_v53 }
  0xfe   :  { %v309_v55 = vpop.eup %308 }
  0xff   :  { %v233_v56 = vmul.f32 0.5, %v229_v54  ;;  %v230_v57 = vadd.f32 1.0, %v309_v55 }
 0x100   :  { %v311_v58 = vpop.eup %310 }
 0x101   :  { %v234_v59 = vmul.f32 0.5, %v230_v57  ;;  %v231_v60 = vadd.f32 1.0, %v311_v58  ;;  %v237_v62 = vmul.f32 %v233_v56, %v201_v26 }
 0x102   :  { %v313_v61 = vpop.eup %312 }
 0x103   :  { %v238_v63 = vmul.f32 %v234_v59, %v202_v29  ;;  %v235_v0 = vmul.f32 0.5, %v231_v60  ;;  %v232_v1 = vadd.f32 1.0, %v313_v61 }
 0x105   :  { %v278_v2 = vpack.c.bf16 %v238_v63, %v237_v62  ;;  %v236_v3 = vmul.f32 0.5, %v232_v1  ;;  %v239_v4 = vmul.f32 %v235_v0, %v203_v33 }
 0x107   :  { %253 = vst [vmem:[%s398_s3] sm:$0xff] %v278_v2  ;;  %v240_v5 = vmul.f32 %v236_v3, %v204_v38 }
 0x109   :  { %v279_v6 = vpack.c.bf16 %v240_v5, %v239_v4 }
 0x10b   :  { %254 = vst [vmem:[%s398_s3 + $0x8] sm:$0xff] %v279_v6 }

</bundles_post_ra>
